<compile_context>
chip_gen: v5e
topology: v5e:2x2
jax: 0.10.0
libtpu: 0.0.40
codegen_flags: <defaults>
</compile_context>

<pallas_src>
import numpy as np
import jax
import jax.numpy as jnp
from jax import lax
from jax.experimental import pallas as pl
from jax.experimental.pallas import tpu as pltpu


def _silu(x):
    return x * jax.nn.sigmoid(x)


OUT_PAD = 128  # lane-dense padded width for the force output (sliced to 3 outside)


# --------------------------------------------------------------------------
# Fused kernel: embedding prologue + one GCL layer per grid step + force head
# grid = (batch, n_layers); h kept in VMEM scratch across the layer axis.
# --------------------------------------------------------------------------
def _fused_egnn_kernel(
    # per-graph data (block index depends on b only -> resident across layers)
    h0_ref, rad_ref, eattr_ref, emask_ref, nmask_ref, arow_ref, acol_ref,
    # per-layer stacked weights (block index depends on l only)
    we1s_ref, we1t_ref, we1r_ref, we1a_ref, be1_ref, we2_ref, be2_ref,
    wn1h_ref, wn1g_ref, wn1n_ref, bn1_ref, wn2_ref, bn2_ref,
    # whole (un-gridded) weights: embedding + force head
    embw_ref, embb_ref,
    w11_ref, b11_ref, w12_ref, b12_ref, w21_ref, b21_ref, w22_ref, b22_ref,
    # output + scratch
    o_ref, h_sc,
):
    l = pl.program_id(1)
    n_layers = pl.num_programs(1)

    h0 = h0_ref[...]                                    # [N_g, in_node_nf]

    # ---- prologue: node embedding (only at the first layer of each graph) ----
    @pl.when(l == 0)
    def _():
        h_sc[...] = (
            jnp.dot(h0, embw_ref[...], preferred_element_type=jnp.float32)
            + embb_ref[...]
        )

    h = h_sc[...]                                       # [N_g, H]
    a_row = arow_ref[...]                               # [E_g, N_g]

    # ---- gathers h[row], h[col] as per-graph one-hot matmuls ----
    h_row = jnp.dot(a_row, h, preferred_element_type=jnp.float32)          # [E_g, H]
    h_col = jnp.dot(acol_ref[...], h, preferred_element_type=jnp.float32)  # [E_g, H]

    # ---- edge MLP: concat([h_row, h_col, radial, edge_attr]) via split weights ----
    pre1 = (
        jnp.dot(h_row, we1s_ref[...], preferred_element_type=jnp.float32)
        + jnp.dot(h_col, we1t_ref[...], preferred_element_type=jnp.float32)
        + rad_ref[...] * we1r_ref[...]                  # [E_g,1] * [1,H] (VPU)
        + jnp.dot(eattr_ref[...], we1a_ref[...], preferred_element_type=jnp.float32)
        + be1_ref[...]
    )
    ef = _silu(pre1)
    ef = _silu(jnp.dot(ef, we2_ref[...], preferred_element_type=jnp.float32)
               + be2_ref[...])
    ef = ef * emask_ref[...]                            # edge masking

    # ---- unsorted_segment_sum over row: contract the E axis of A_row directly ----
    agg = lax.dot_general(
        a_row, ef,
        dimension_numbers=(((0,), (0,)), ((), ())),
        preferred_element_type=jnp.float32,
    )                                                   # [N_g, H]

    # ---- node MLP: concat([h, agg, h0]) via split weights + residual ----
    pre2 = (
        jnp.dot(h, wn1h_ref[...], preferred_element_type=jnp.float32)
        + jnp.dot(agg, wn1g_ref[...], preferred_element_type=jnp.float32)
        + jnp.dot(h0, wn1n_ref[...], preferred_element_type=jnp.float32)
        + bn1_ref[...]
    )
    h_new = h + (
        jnp.dot(_silu(pre2), wn2_ref[...], preferred_element_type=jnp.float32)
        + bn2_ref[...]
    )
    h_sc[...] = h_new

    # ---- epilogue: force head (only after the last layer) ----
    @pl.when(l == n_layers - 1)
    def _():
        f = (
            jnp.dot(
                _silu(jnp.dot(h_new, w11_ref[...],
                              preferred_element_type=jnp.float32) + b11_ref[...]),
                w12_ref[...], preferred_element_type=jnp.float32)
            + b12_ref[...]
        )
        f = f * nmask_ref[...]                          # node masking
        g = _silu(jnp.dot(f, w21_ref[...], preferred_element_type=jnp.float32)
                  + b21_ref[...])
        o_ref[...] = (
            jnp.dot(g, w22_ref[...], preferred_element_type=jnp.float32)
            + b22_ref[...]
        )                                               # [N_g, OUT_PAD]


# --------------------------------------------------------------------------
# Wrapper: build per-graph slabs, stack per-layer weights, call the kernel.
# --------------------------------------------------------------------------
def force_egnn_pallas(params, h0, x, rows, cols, edge_attr, node_mask, edge_mask,
                      n_nodes, hidden_nf):
    n_total = h0.shape[0]
    batch = n_total // n_nodes
    e_total = rows.shape[0]
    e_g = e_total // batch                 # edges per graph (grouped per graph)
    H = hidden_nf
    in_node_nf = h0.shape[1]
    in_edge_nf = edge_attr.shape[1]
    L = len(params["gcl"])

    # --- hoisted geometry: radial computed once (x is constant across layers) ---
    coord_diff = x[rows] - x[cols]
    radial = jnp.sum(coord_diff * coord_diff, axis=1, keepdims=True)     # [E, 1]

    # --- per-graph (block-diagonal) one-hot gather matrices [B, E_g, N_g] ---
    off = (jnp.arange(batch, dtype=rows.dtype) * n_nodes)[:, None]
    rows_loc = rows.reshape(batch, e_g) - off
    cols_loc = cols.reshape(batch, e_g) - off
    a_row = jax.nn.one_hot(rows_loc, n_nodes, dtype=jnp.float32)
    a_col = jax.nn.one_hot(cols_loc, n_nodes, dtype=jnp.float32)

    # --- 3-D per-graph slabs (leading batch axis is the gridded "parallel" axis) ---
    h0_3 = h0.reshape(batch, n_nodes, in_node_nf)
    radial_3 = radial.reshape(batch, e_g, 1)
    eattr_3 = edge_attr.reshape(batch, e_g, in_edge_nf)
    emask_3 = edge_mask.reshape(batch, e_g, 1)
    nmask_3 = node_mask.reshape(batch, n_nodes, 1)

    # --- stacked per-layer weights, split so no in-kernel concat is needed ---
    gcl = params["gcl"]
    we1 = jnp.stack([p["we1"] for p in gcl])                 # [L, 2H+1+E_in, H]
    be1 = jnp.stack([p["be1"] for p in gcl]).reshape(L, 1, H)
    we2 = jnp.stack([p["we2"] for p in gcl])                 # [L, H, H]
    be2 = jnp.stack([p["be2"] for p in gcl]).reshape(L, 1, H)
    wn1 = jnp.stack([p["wn1"] for p in gcl])                 # [L, 2H+node_nf, H]
    bn1 = jnp.stack([p["bn1"] for p in gcl]).reshape(L, 1, H)
    wn2 = jnp.stack([p["wn2"] for p in gcl])                 # [L, H, H]
    bn2 = jnp.stack([p["bn2"] for p in gcl]).reshape(L, 1, H)

    we1_s, we1_t = we1[:, 0:H, :], we1[:, H:2 * H, :]
    we1_r, we1_a = we1[:, 2 * H:2 * H + 1, :], we1[:, 2 * H + 1:, :]
    wn1_h, wn1_g, wn1_n = wn1[:, 0:H, :], wn1[:, H:2 * H, :], wn1[:, 2 * H:, :]

    fp = params["force"]
    # lane-dense padded force_2 output weights ([H,3] -> [H,128], sliced outside)
    w22p = jnp.zeros((H, OUT_PAD), jnp.float32).at[:, :3].set(fp["w22"])
    b22p = jnp.zeros((1, OUT_PAD), jnp.float32).at[0, :3].set(fp["b22"])

    def node_spec(feat):
        return pl.BlockSpec((None, n_nodes, feat), lambda b, l: (b, 0, 0))

    def edge_spec(feat):
        return pl.BlockSpec((None, e_g, feat), lambda b, l: (b, 0, 0))

    def layer_spec(k, n):
        return pl.BlockSpec((None, k, n), lambda b, l: (l, 0, 0))

    def whole_spec(arr):
        return pl.BlockSpec(arr.shape, lambda b, l: (0,) * arr.ndim)

    emb_b = params["emb_b"].reshape(1, H)
    b11 = fp["b11"].reshape(1, H)
    b12 = fp["b12"].reshape(1, H)
    b21 = fp["b21"].reshape(1, H)

    args = (
        h0_3, radial_3, eattr_3, emask_3, nmask_3, a_row, a_col,
        we1_s, we1_t, we1_r, we1_a, be1, we2, be2,
        wn1_h, wn1_g, wn1_n, bn1, wn2, bn2,
        params["emb_w"], emb_b,
        fp["w11"], b11, fp["w12"], b12,
        fp["w21"], b21, w22p, b22p,
    )
    in_specs = [
        node_spec(in_node_nf), edge_spec(1), edge_spec(in_edge_nf), edge_spec(1),
        node_spec(1), edge_spec(n_nodes), edge_spec(n_nodes),
        layer_spec(H, H), layer_spec(H, H), layer_spec(1, H),
        layer_spec(in_edge_nf, H), layer_spec(1, H),
        layer_spec(H, H), layer_spec(1, H),
        layer_spec(H, H), layer_spec(H, H), layer_spec(in_node_nf, H),
        layer_spec(1, H), layer_spec(H, H), layer_spec(1, H),
        whole_spec(params["emb_w"]), whole_spec(emb_b),
        whole_spec(fp["w11"]), whole_spec(b11),
        whole_spec(fp["w12"]), whole_spec(b12),
        whole_spec(fp["w21"]), whole_spec(b21),
        whole_spec(w22p), whole_spec(b22p),
    ]

    out = pl.pallas_call(
        _fused_egnn_kernel,
        out_shape=jax.ShapeDtypeStruct((batch, n_nodes, OUT_PAD), jnp.float32),
        grid_spec=pltpu.PrefetchScalarGridSpec(
            num_scalar_prefetch=0,
            grid=(batch, L),
            in_specs=in_specs,
            out_specs=pl.BlockSpec((None, n_nodes, OUT_PAD),
                                   lambda b, l: (b, 0, 0)),
            scratch_shapes=[pltpu.VMEM((n_nodes, H), jnp.float32)],
        ),
        compiler_params=pltpu.CompilerParams(
            dimension_semantics=("parallel", "arbitrary")),
    )(*args)

    force = out[:, :, :3]
    if n_nodes == 1:                       # pred_force.squeeze(1)
        force = force.reshape(batch, 3)
    return {"force": force}


# --------------------------------------------------------------------------
# Parameter init (deterministic; matches shapes implied by nn.Linear)
# Weights stored [in, out] (transposed vs torch), so y = x @ W + b.
# --------------------------------------------------------------------------
def _init_linear(key, fan_in, fan_out):
    kw, kb = jax.random.split(key)
    bound = 1.0 / np.sqrt(fan_in)
    w = jax.random.uniform(kw, (fan_in, fan_out), jnp.float32, -bound, bound)
    b = jax.random.uniform(kb, (fan_out,), jnp.float32, -bound, bound)
    return w, b


def init_force_egnn_params(key, in_node_nf, in_edge_nf, hidden_nf, n_layers):
    keys = jax.random.split(key, 2 + 6 * n_layers + 4)
    ki = iter(keys)
    params = {}
    params["emb_w"], params["emb_b"] = _init_linear(next(ki), in_node_nf, hidden_nf)
    layers = []
    for _ in range(n_layers):
        H = hidden_nf
        edge_in = 2 * H + 1 + in_edge_nf          # [source, target, radial, edge_attr]
        node_in = H + H + in_node_nf              # [h, agg, node_attr(=h0)]
        we1, be1 = _init_linear(next(ki), edge_in, H)
        we2, be2 = _init_linear(next(ki), H, H)
        wn1, bn1 = _init_linear(next(ki), node_in, H)
        wn2, bn2 = _init_linear(next(ki), H, H)
        layers.append(dict(we1=we1, be1=be1, we2=we2, be2=be2,
                           wn1=wn1, bn1=bn1, wn2=wn2, bn2=bn2))
    params["gcl"] = layers
    w11, b11 = _init_linear(next(ki), hidden_nf, hidden_nf)
    w12, b12 = _init_linear(next(ki), hidden_nf, hidden_nf)
    w21, b21 = _init_linear(next(ki), hidden_nf, hidden_nf)
    w22, b22 = _init_linear(next(ki), hidden_nf, 3)
    params["force"] = dict(w11=w11, b11=b11, w12=w12, b12=b12,
                           w21=w21, b21=b21, w22=w22, b22=b22)
    return params


# --------------------------------------------------------------------------
# Pure-JAX reference (semantics of the PyTorch module) for verification
# --------------------------------------------------------------------------
def force_egnn_reference(params, h0, x, rows, cols, edge_attr, node_mask,
                         edge_mask, n_nodes):
    def lin(z, w, b):
        return z @ w + b

    h = lin(h0, params["emb_w"], params["emb_b"])
    for p in params["gcl"]:
        coord_diff = x[rows] - x[cols]
        radial = jnp.sum(coord_diff ** 2, axis=1, keepdims=True)
        edge_in = jnp.concatenate([h[rows], h[cols], radial, edge_attr], axis=1)
        ef = _silu(lin(edge_in, p["we1"], p["be1"]))
        ef = _silu(lin(ef, p["we2"], p["be2"]))
        ef = ef * edge_mask
        agg = jax.ops.segment_sum(ef, rows, num_segments=h.shape[0])
        node_in = jnp.concatenate([h, agg, h0], axis=1)
        out = lin(_silu(lin(node_in, p["wn1"], p["bn1"])), p["wn2"], p["bn2"])
        h = h + out
    fp = params["force"]
    f = lin(_silu(lin(h, fp["w11"], fp["b11"])), fp["w12"], fp["b12"])
    f = f * node_mask
    g = lin(_silu(lin(f, fp["w21"], fp["b21"])), fp["w22"], fp["b22"])
    batch = h0.shape[0] // n_nodes
    g = g.reshape(batch, n_nodes, 3)
    if n_nodes == 1:
        g = g.reshape(batch, 3)
    return {"force": g}


def build_edges(n_nodes, batch):
    # fully connected per graph, edges grouped by graph (standard ForceEGNN batching)
    rows, cols = [], []
    for b in range(batch):
        off = b * n_nodes
        for i in range(n_nodes):
            for j in range(n_nodes):
                if i != j:
                    rows.append(off + i)
                    cols.append(off + j)
    return np.asarray(rows, np.int32), np.asarray(cols, np.int32)


if __name__ == "__main__":
    batch, n_nodes = 2, 4
    in_node_nf, in_edge_nf, hidden_nf, n_layers = 5, 2, 32, 4
    n_total = batch * n_nodes

    rows_np, cols_np = build_edges(n_nodes, batch)      # fully connected per graph
    n_edges = rows_np.shape[0]                           # 24

    key = jax.random.PRNGKey(0)
    k_par, k_h, k_x, k_e = jax.random.split(key, 4)

    params = init_force_egnn_params(k_par, in_node_nf, in_edge_nf, hidden_nf,
                                    n_layers)

    h0 = jax.random.normal(k_h, (n_total, in_node_nf), jnp.float32)
    x = jax.random.normal(k_x, (n_total, 3), jnp.float32)
    edge_attr = jax.random.normal(k_e, (n_edges, in_edge_nf), jnp.float32)

    node_mask = jnp.ones((n_total, 1), jnp.float32).at[-1, 0].set(0.0)
    rows = jnp.asarray(rows_np)
    cols = jnp.asarray(cols_np)
    edge_mask = node_mask[rows] * node_mask[cols]        # [E, 1]

    out = force_egnn_pallas(params, h0, x, rows, cols, edge_attr, node_mask,
                            edge_mask, n_nodes, hidden_nf)
    jax.block_until_ready(out["force"])

    ref = force_egnn_reference(params, h0, x, rows, cols, edge_attr, node_mask,
                               edge_mask, n_nodes)
    np.testing.assert_allclose(np.asarray(out["force"]),
                               np.asarray(ref["force"]),
                               rtol=1e-4, atol=1e-4)
    print("KERNEL_OK")
</pallas_src>

<mosaic_0001>
module attributes {stable_mosaic.version = 11 : i64} {
  func.func @_fused_egnn_kernel(%arg0: i32, %arg1: i32, %arg2: memref<1x4x5xf32, #tpu.memory_space<vmem>>, %arg3: memref<1x12x1xf32, #tpu.memory_space<vmem>>, %arg4: memref<1x12x2xf32, #tpu.memory_space<vmem>>, %arg5: memref<1x12x1xf32, #tpu.memory_space<vmem>>, %arg6: memref<1x4x1xf32, #tpu.memory_space<vmem>>, %arg7: memref<1x12x4xf32, #tpu.memory_space<vmem>>, %arg8: memref<1x12x4xf32, #tpu.memory_space<vmem>>, %arg9: memref<1x32x32xf32, #tpu.memory_space<vmem>>, %arg10: memref<1x32x32xf32, #tpu.memory_space<vmem>>, %arg11: memref<1x1x32xf32, #tpu.memory_space<vmem>>, %arg12: memref<1x2x32xf32, #tpu.memory_space<vmem>>, %arg13: memref<1x1x32xf32, #tpu.memory_space<vmem>>, %arg14: memref<1x32x32xf32, #tpu.memory_space<vmem>>, %arg15: memref<1x1x32xf32, #tpu.memory_space<vmem>>, %arg16: memref<1x32x32xf32, #tpu.memory_space<vmem>>, %arg17: memref<1x32x32xf32, #tpu.memory_space<vmem>>, %arg18: memref<1x5x32xf32, #tpu.memory_space<vmem>>, %arg19: memref<1x1x32xf32, #tpu.memory_space<vmem>>, %arg20: memref<1x32x32xf32, #tpu.memory_space<vmem>>, %arg21: memref<1x1x32xf32, #tpu.memory_space<vmem>>, %arg22: memref<5x32xf32, #tpu.memory_space<vmem>>, %arg23: memref<1x32xf32, #tpu.memory_space<vmem>>, %arg24: memref<32x32xf32, #tpu.memory_space<vmem>>, %arg25: memref<1x32xf32, #tpu.memory_space<vmem>>, %arg26: memref<32x32xf32, #tpu.memory_space<vmem>>, %arg27: memref<1x32xf32, #tpu.memory_space<vmem>>, %arg28: memref<32x32xf32, #tpu.memory_space<vmem>>, %arg29: memref<1x32xf32, #tpu.memory_space<vmem>>, %arg30: memref<32x128xf32, #tpu.memory_space<vmem>>, %arg31: memref<1x128xf32, #tpu.memory_space<vmem>>, %arg32: memref<1x4x128xf32, #tpu.memory_space<vmem>>, %arg33: memref<4x32xf32, #tpu.memory_space<vmem>>) attributes {dimension_semantics = [#tpu.dimension_semantics<parallel>, #tpu.dimension_semantics<arbitrary>], iteration_bounds = array<i64: 2, 4>, scalar_prefetch = 0 : i64, scratch_operands = 1 : i64, tpu.core_type = #tpu.core_type<tc>, window_params = [{transform_indices = @transform_0, window_bounds = array<i64: 1, 4, 5>}, {transform_indices = @transform_1, window_bounds = array<i64: 1, 12, 1>}, {transform_indices = @transform_2, window_bounds = array<i64: 1, 12, 2>}, {transform_indices = @transform_3, window_bounds = array<i64: 1, 12, 1>}, {transform_indices = @transform_4, window_bounds = array<i64: 1, 4, 1>}, {transform_indices = @transform_5, window_bounds = array<i64: 1, 12, 4>}, {transform_indices = @transform_6, window_bounds = array<i64: 1, 12, 4>}, {transform_indices = @transform_7, window_bounds = array<i64: 1, 32, 32>}, {transform_indices = @transform_8, window_bounds = array<i64: 1, 32, 32>}, {transform_indices = @transform_9, window_bounds = array<i64: 1, 1, 32>}, {transform_indices = @transform_10, window_bounds = array<i64: 1, 2, 32>}, {transform_indices = @transform_11, window_bounds = array<i64: 1, 1, 32>}, {transform_indices = @transform_12, window_bounds = array<i64: 1, 32, 32>}, {transform_indices = @transform_13, window_bounds = array<i64: 1, 1, 32>}, {transform_indices = @transform_14, window_bounds = array<i64: 1, 32, 32>}, {transform_indices = @transform_15, window_bounds = array<i64: 1, 32, 32>}, {transform_indices = @transform_16, window_bounds = array<i64: 1, 5, 32>}, {transform_indices = @transform_17, window_bounds = array<i64: 1, 1, 32>}, {transform_indices = @transform_18, window_bounds = array<i64: 1, 32, 32>}, {transform_indices = @transform_19, window_bounds = array<i64: 1, 1, 32>}, {pipeline_mode = #tpu.pipeline_mode<synchronous>, transform_indices = @transform_20, window_bounds = array<i64: 5, 32>}, {pipeline_mode = #tpu.pipeline_mode<synchronous>, transform_indices = @transform_21, window_bounds = array<i64: 1, 32>}, {pipeline_mode = #tpu.pipeline_mode<synchronous>, transform_indices = @transform_22, window_bounds = array<i64: 32, 32>}, {pipeline_mode = #tpu.pipeline_mode<synchronous>, transform_indices = @transform_23, window_bounds = array<i64: 1, 32>}, {pipeline_mode = #tpu.pipeline_mode<synchronous>, transform_indices = @transform_24, window_bounds = array<i64: 32, 32>}, {pipeline_mode = #tpu.pipeline_mode<synchronous>, transform_indices = @transform_25, window_bounds = array<i64: 1, 32>}, {pipeline_mode = #tpu.pipeline_mode<synchronous>, transform_indices = @transform_26, window_bounds = array<i64: 32, 32>}, {pipeline_mode = #tpu.pipeline_mode<synchronous>, transform_indices = @transform_27, window_bounds = array<i64: 1, 32>}, {pipeline_mode = #tpu.pipeline_mode<synchronous>, transform_indices = @transform_28, window_bounds = array<i64: 32, 128>}, {pipeline_mode = #tpu.pipeline_mode<synchronous>, transform_indices = @transform_29, window_bounds = array<i64: 1, 128>}, {transform_indices = @transform_30, window_bounds = array<i64: 1, 4, 128>}]} {
    %c0 = arith.constant 0 : index
    %c0_0 = arith.constant 0 : index
    %c0_1 = arith.constant 0 : index
    %0 = vector.load %arg2[%c0, %c0_0, %c0_1] : memref<1x4x5xf32, #tpu.memory_space<vmem>>, vector<1x4x5xf32>
    %1 = vector.shape_cast %0 : vector<1x4x5xf32> to vector<4x5xf32>
    %c0_i32 = arith.constant 0 : i32
    %2 = arith.cmpi eq, %arg1, %c0_i32 : i32
    %3 = arith.extui %2 : i1 to i32
    %c0_i32_2 = arith.constant 0 : i32
    %4 = arith.cmpi ne, %3, %c0_i32_2 : i32
    scf.if %4 {
      %c0_75 = arith.constant 0 : index
      %c0_76 = arith.constant 0 : index
      %94 = vector.load %arg22[%c0_75, %c0_76] : memref<5x32xf32, #tpu.memory_space<vmem>>, vector<5x32xf32>
      %cst_77 = arith.constant dense<0.000000e+00> : vector<4x32xf32>
      %95 = tpu.matmul %1, %94, %cst_77 {dimension_numbers = #tpu.dot_dimension_numbers<[1], [0], [0], [1], [0, 0, 1, 1], [], []>} : vector<4x5xf32>, vector<5x32xf32>, vector<4x32xf32> -> vector<4x32xf32>
      %c0_78 = arith.constant 0 : index
      %c0_79 = arith.constant 0 : index
      %96 = vector.load %arg23[%c0_78, %c0_79] : memref<1x32xf32, #tpu.memory_space<vmem>>, vector<1x32xf32>
      %97 = vector.broadcast %96 : vector<1x32xf32> to vector<4x32xf32>
      %98 = arith.addf %95, %97 : vector<4x32xf32>
      %c0_80 = arith.constant 0 : index
      %c0_81 = arith.constant 0 : index
      %99 = vector.load %arg33[%c0_80, %c0_81] : memref<4x32xf32, #tpu.memory_space<vmem>>, vector<4x32xf32>
      tpu.vector_store %arg33[%c0_80, %c0_81], %98 {strides = array<i32>} : memref<4x32xf32, #tpu.memory_space<vmem>>, vector<4x32xf32>,
    } else {
    }
    %c0_3 = arith.constant 0 : index
    %c0_4 = arith.constant 0 : index
    %5 = vector.load %arg33[%c0_3, %c0_4] : memref<4x32xf32, #tpu.memory_space<vmem>>, vector<4x32xf32>
    %c0_5 = arith.constant 0 : index
    %c0_6 = arith.constant 0 : index
    %c0_7 = arith.constant 0 : index
    %6 = vector.load %arg7[%c0_5, %c0_6, %c0_7] : memref<1x12x4xf32, #tpu.memory_space<vmem>>, vector<1x12x4xf32>
    %7 = vector.shape_cast %6 : vector<1x12x4xf32> to vector<12x4xf32>
    %cst = arith.constant dense<0.000000e+00> : vector<12x32xf32>
    %8 = tpu.matmul %7, %5, %cst {dimension_numbers = #tpu.dot_dimension_numbers<[1], [0], [0], [1], [0, 0, 1, 1], [], []>} : vector<12x4xf32>, vector<4x32xf32>, vector<12x32xf32> -> vector<12x32xf32>
    %c0_8 = arith.constant 0 : index
    %c0_9 = arith.constant 0 : index
    %c0_10 = arith.constant 0 : index
    %9 = vector.load %arg8[%c0_8, %c0_9, %c0_10] : memref<1x12x4xf32, #tpu.memory_space<vmem>>, vector<1x12x4xf32>
    %10 = vector.shape_cast %9 : vector<1x12x4xf32> to vector<12x4xf32>
    %cst_11 = arith.constant dense<0.000000e+00> : vector<12x32xf32>
    %11 = tpu.matmul %10, %5, %cst_11 {dimension_numbers = #tpu.dot_dimension_numbers<[1], [0], [0], [1], [0, 0, 1, 1], [], []>} : vector<12x4xf32>, vector<4x32xf32>, vector<12x32xf32> -> vector<12x32xf32>
    %c0_12 = arith.constant 0 : index
    %c0_13 = arith.constant 0 : index
    %c0_14 = arith.constant 0 : index
    %12 = vector.load %arg9[%c0_12, %c0_13, %c0_14] : memref<1x32x32xf32, #tpu.memory_space<vmem>>, vector<1x32x32xf32>
    %13 = vector.shape_cast %12 : vector<1x32x32xf32> to vector<32x32xf32>
    %cst_15 = arith.constant dense<0.000000e+00> : vector<12x32xf32>
    %14 = tpu.matmul %8, %13, %cst_15 {dimension_numbers = #tpu.dot_dimension_numbers<[1], [0], [0], [1], [0, 0, 1, 1], [], []>} : vector<12x32xf32>, vector<32x32xf32>, vector<12x32xf32> -> vector<12x32xf32>
    %c0_16 = arith.constant 0 : index
    %c0_17 = arith.constant 0 : index
    %c0_18 = arith.constant 0 : index
    %15 = vector.load %arg10[%c0_16, %c0_17, %c0_18] : memref<1x32x32xf32, #tpu.memory_space<vmem>>, vector<1x32x32xf32>
    %16 = vector.shape_cast %15 : vector<1x32x32xf32> to vector<32x32xf32>
    %cst_19 = arith.constant dense<0.000000e+00> : vector<12x32xf32>
    %17 = tpu.matmul %11, %16, %cst_19 {dimension_numbers = #tpu.dot_dimension_numbers<[1], [0], [0], [1], [0, 0, 1, 1], [], []>} : vector<12x32xf32>, vector<32x32xf32>, vector<12x32xf32> -> vector<12x32xf32>
    %18 = arith.addf %14, %17 : vector<12x32xf32>
    %c0_20 = arith.constant 0 : index
    %c0_21 = arith.constant 0 : index
    %c0_22 = arith.constant 0 : index
    %19 = vector.load %arg3[%c0_20, %c0_21, %c0_22] : memref<1x12x1xf32, #tpu.memory_space<vmem>>, vector<1x12x1xf32>
    %20 = vector.shape_cast %19 : vector<1x12x1xf32> to vector<12x1xf32>
    %c0_23 = arith.constant 0 : index
    %c0_24 = arith.constant 0 : index
    %c0_25 = arith.constant 0 : index
    %21 = vector.load %arg11[%c0_23, %c0_24, %c0_25] : memref<1x1x32xf32, #tpu.memory_space<vmem>>, vector<1x1x32xf32>
    %22 = vector.shape_cast %21 : vector<1x1x32xf32> to vector<1x32xf32>
    %23 = vector.broadcast %20 : vector<12x1xf32> to vector<12x32xf32>
    %24 = vector.broadcast %22 : vector<1x32xf32> to vector<12x32xf32>
    %25 = arith.mulf %23, %24 : vector<12x32xf32>
    %26 = arith.addf %18, %25 : vector<12x32xf32>
    %c0_26 = arith.constant 0 : index
    %c0_27 = arith.constant 0 : index
    %c0_28 = arith.constant 0 : index
    %27 = vector.load %arg4[%c0_26, %c0_27, %c0_28] : memref<1x12x2xf32, #tpu.memory_space<vmem>>, vector<1x12x2xf32>
    %28 = vector.shape_cast %27 : vector<1x12x2xf32> to vector<12x2xf32>
    %c0_29 = arith.constant 0 : index
    %c0_30 = arith.constant 0 : index
    %c0_31 = arith.constant 0 : index
    %29 = vector.load %arg12[%c0_29, %c0_30, %c0_31] : memref<1x2x32xf32, #tpu.memory_space<vmem>>, vector<1x2x32xf32>
    %30 = vector.shape_cast %29 : vector<1x2x32xf32> to vector<2x32xf32>
    %cst_32 = arith.constant dense<0.000000e+00> : vector<12x32xf32>
    %31 = tpu.matmul %28, %30, %cst_32 {dimension_numbers = #tpu.dot_dimension_numbers<[1], [0], [0], [1], [0, 0, 1, 1], [], []>} : vector<12x2xf32>, vector<2x32xf32>, vector<12x32xf32> -> vector<12x32xf32>
    %32 = arith.addf %26, %31 : vector<12x32xf32>
    %c0_33 = arith.constant 0 : index
    %c0_34 = arith.constant 0 : index
    %c0_35 = arith.constant 0 : index
    %33 = vector.load %arg13[%c0_33, %c0_34, %c0_35] : memref<1x1x32xf32, #tpu.memory_space<vmem>>, vector<1x1x32xf32>
    %34 = vector.shape_cast %33 : vector<1x1x32xf32> to vector<1x32xf32>
    %35 = vector.broadcast %34 : vector<1x32xf32> to vector<12x32xf32>
    %36 = arith.addf %32, %35 : vector<12x32xf32>
    %37 = arith.negf %36 : vector<12x32xf32>
    %38 = math.exp %37 : vector<12x32xf32>
    %cst_36 = arith.constant 1.000000e+00 : f32
    %39 = vector.broadcast %cst_36 : f32 to vector<12x32xf32>
    %40 = arith.addf %39, %38 : vector<12x32xf32>
    %41 = arith.divf %39, %40 : vector<12x32xf32>
    %42 = arith.mulf %36, %41 : vector<12x32xf32>
    %c0_37 = arith.constant 0 : index
    %c0_38 = arith.constant 0 : index
    %c0_39 = arith.constant 0 : index
    %43 = vector.load %arg14[%c0_37, %c0_38, %c0_39] : memref<1x32x32xf32, #tpu.memory_space<vmem>>, vector<1x32x32xf32>
    %44 = vector.shape_cast %43 : vector<1x32x32xf32> to vector<32x32xf32>
    %cst_40 = arith.constant dense<0.000000e+00> : vector<12x32xf32>
    %45 = tpu.matmul %42, %44, %cst_40 {dimension_numbers = #tpu.dot_dimension_numbers<[1], [0], [0], [1], [0, 0, 1, 1], [], []>} : vector<12x32xf32>, vector<32x32xf32>, vector<12x32xf32> -> vector<12x32xf32>
    %c0_41 = arith.constant 0 : index
    %c0_42 = arith.constant 0 : index
    %c0_43 = arith.constant 0 : index
    %46 = vector.load %arg15[%c0_41, %c0_42, %c0_43] : memref<1x1x32xf32, #tpu.memory_space<vmem>>, vector<1x1x32xf32>
    %47 = vector.shape_cast %46 : vector<1x1x32xf32> to vector<1x32xf32>
    %48 = vector.broadcast %47 : vector<1x32xf32> to vector<12x32xf32>
    %49 = arith.addf %45, %48 : vector<12x32xf32>
    %50 = arith.negf %49 : vector<12x32xf32>
    %51 = math.exp %50 : vector<12x32xf32>
    %cst_44 = arith.constant 1.000000e+00 : f32
    %52 = vector.broadcast %cst_44 : f32 to vector<12x32xf32>
    %53 = arith.addf %52, %51 : vector<12x32xf32>
    %54 = arith.divf %52, %53 : vector<12x32xf32>
    %55 = arith.mulf %49, %54 : vector<12x32xf32>
    %c0_45 = arith.constant 0 : index
    %c0_46 = arith.constant 0 : index
    %c0_47 = arith.constant 0 : index
    %56 = vector.load %arg5[%c0_45, %c0_46, %c0_47] : memref<1x12x1xf32, #tpu.memory_space<vmem>>, vector<1x12x1xf32>
    %57 = vector.shape_cast %56 : vector<1x12x1xf32> to vector<12x1xf32>
    %58 = vector.broadcast %57 : vector<12x1xf32> to vector<12x32xf32>
    %59 = arith.mulf %55, %58 : vector<12x32xf32>
    %cst_48 = arith.constant dense<0.000000e+00> : vector<4x32xf32>
    %60 = tpu.matmul %7, %59, %cst_48 {dimension_numbers = #tpu.dot_dimension_numbers<[0], [0], [1], [1], [0, 1, 1, 1], [], []>} : vector<12x4xf32>, vector<12x32xf32>, vector<4x32xf32> -> vector<4x32xf32>
    %c0_49 = arith.constant 0 : index
    %c0_50 = arith.constant 0 : index
    %c0_51 = arith.constant 0 : index
    %61 = vector.load %arg16[%c0_49, %c0_50, %c0_51] : memref<1x32x32xf32, #tpu.memory_space<vmem>>, vector<1x32x32xf32>
    %62 = vector.shape_cast %61 : vector<1x32x32xf32> to vector<32x32xf32>
    %cst_52 = arith.constant dense<0.000000e+00> : vector<4x32xf32>
    %63 = tpu.matmul %5, %62, %cst_52 {dimension_numbers = #tpu.dot_dimension_numbers<[1], [0], [0], [1], [0, 0, 1, 1], [], []>} : vector<4x32xf32>, vector<32x32xf32>, vector<4x32xf32> -> vector<4x32xf32>
    %c0_53 = arith.constant 0 : index
    %c0_54 = arith.constant 0 : index
    %c0_55 = arith.constant 0 : index
    %64 = vector.load %arg17[%c0_53, %c0_54, %c0_55] : memref<1x32x32xf32, #tpu.memory_space<vmem>>, vector<1x32x32xf32>
    %65 = vector.shape_cast %64 : vector<1x32x32xf32> to vector<32x32xf32>
    %cst_56 = arith.constant dense<0.000000e+00> : vector<4x32xf32>
    %66 = tpu.matmul %60, %65, %cst_56 {dimension_numbers = #tpu.dot_dimension_numbers<[1], [0], [0], [1], [0, 0, 1, 1], [], []>} : vector<4x32xf32>, vector<32x32xf32>, vector<4x32xf32> -> vector<4x32xf32>
    %67 = arith.addf %63, %66 : vector<4x32xf32>
    %c0_57 = arith.constant 0 : index
    %c0_58 = arith.constant 0 : index
    %c0_59 = arith.constant 0 : index
    %68 = vector.load %arg18[%c0_57, %c0_58, %c0_59] : memref<1x5x32xf32, #tpu.memory_space<vmem>>, vector<1x5x32xf32>
    %69 = vector.shape_cast %68 : vector<1x5x32xf32> to vector<5x32xf32>
    %cst_60 = arith.constant dense<0.000000e+00> : vector<4x32xf32>
    %70 = tpu.matmul %1, %69, %cst_60 {dimension_numbers = #tpu.dot_dimension_numbers<[1], [0], [0], [1], [0, 0, 1, 1], [], []>} : vector<4x5xf32>, vector<5x32xf32>, vector<4x32xf32> -> vector<4x32xf32>
    %71 = arith.addf %67, %70 : vector<4x32xf32>
    %c0_61 = arith.constant 0 : index
    %c0_62 = arith.constant 0 : index
    %c0_63 = arith.constant 0 : index
    %72 = vector.load %arg19[%c0_61, %c0_62, %c0_63] : memref<1x1x32xf32, #tpu.memory_space<vmem>>, vector<1x1x32xf32>
    %73 = vector.shape_cast %72 : vector<1x1x32xf32> to vector<1x32xf32>
    %74 = vector.broadcast %73 : vector<1x32xf32> to vector<4x32xf32>
    %75 = arith.addf %71, %74 : vector<4x32xf32>
    %76 = arith.negf %75 : vector<4x32xf32>
    %77 = math.exp %76 : vector<4x32xf32>
    %cst_64 = arith.constant 1.000000e+00 : f32
    %78 = vector.broadcast %cst_64 : f32 to vector<4x32xf32>
    %79 = arith.addf %78, %77 : vector<4x32xf32>
    %80 = arith.divf %78, %79 : vector<4x32xf32>
    %81 = arith.mulf %75, %80 : vector<4x32xf32>
    %c0_65 = arith.constant 0 : index
    %c0_66 = arith.constant 0 : index
    %c0_67 = arith.constant 0 : index
    %82 = vector.load %arg20[%c0_65, %c0_66, %c0_67] : memref<1x32x32xf32, #tpu.memory_space<vmem>>, vector<1x32x32xf32>
    %83 = vector.shape_cast %82 : vector<1x32x32xf32> to vector<32x32xf32>
    %cst_68 = arith.constant dense<0.000000e+00> : vector<4x32xf32>
    %84 = tpu.matmul %81, %83, %cst_68 {dimension_numbers = #tpu.dot_dimension_numbers<[1], [0], [0], [1], [0, 0, 1, 1], [], []>} : vector<4x32xf32>, vector<32x32xf32>, vector<4x32xf32> -> vector<4x32xf32>
    %c0_69 = arith.constant 0 : index
    %c0_70 = arith.constant 0 : index
    %c0_71 = arith.constant 0 : index
    %85 = vector.load %arg21[%c0_69, %c0_70, %c0_71] : memref<1x1x32xf32, #tpu.memory_space<vmem>>, vector<1x1x32xf32>
    %86 = vector.shape_cast %85 : vector<1x1x32xf32> to vector<1x32xf32>
    %87 = vector.broadcast %86 : vector<1x32xf32> to vector<4x32xf32>
    %88 = arith.addf %84, %87 : vector<4x32xf32>
    %89 = arith.addf %5, %88 : vector<4x32xf32>
    %c0_72 = arith.constant 0 : index
    %c0_73 = arith.constant 0 : index
    %90 = vector.load %arg33[%c0_72, %c0_73] : memref<4x32xf32, #tpu.memory_space<vmem>>, vector<4x32xf32>
    tpu.vector_store %arg33[%c0_72, %c0_73], %89 {strides = array<i32>} : memref<4x32xf32, #tpu.memory_space<vmem>>, vector<4x32xf32>,
    %c3_i32 = arith.constant 3 : i32
    %91 = arith.cmpi eq, %arg1, %c3_i32 : i32
    %92 = arith.extui %91 : i1 to i32
    %c0_i32_74 = arith.constant 0 : i32
    %93 = arith.cmpi ne, %92, %c0_i32_74 : i32
    scf.if %93 {
      %c0_75 = arith.constant 0 : index
      %c0_76 = arith.constant 0 : index
      %94 = vector.load %arg24[%c0_75, %c0_76] : memref<32x32xf32, #tpu.memory_space<vmem>>, vector<32x32xf32>
      %cst_77 = arith.constant dense<0.000000e+00> : vector<4x32xf32>
      %95 = tpu.matmul %89, %94, %cst_77 {dimension_numbers = #tpu.dot_dimension_numbers<[1], [0], [0], [1], [0, 0, 1, 1], [], []>} : vector<4x32xf32>, vector<32x32xf32>, vector<4x32xf32> -> vector<4x32xf32>
      %c0_78 = arith.constant 0 : index
      %c0_79 = arith.constant 0 : index
      %96 = vector.load %arg25[%c0_78, %c0_79] : memref<1x32xf32, #tpu.memory_space<vmem>>, vector<1x32xf32>
      %97 = vector.broadcast %96 : vector<1x32xf32> to vector<4x32xf32>
      %98 = arith.addf %95, %97 : vector<4x32xf32>
      %99 = arith.negf %98 : vector<4x32xf32>
      %100 = math.exp %99 : vector<4x32xf32>
      %cst_80 = arith.constant 1.000000e+00 : f32
      %101 = vector.broadcast %cst_80 : f32 to vector<4x32xf32>
      %102 = arith.addf %101, %100 : vector<4x32xf32>
      %103 = arith.divf %101, %102 : vector<4x32xf32>
      %104 = arith.mulf %98, %103 : vector<4x32xf32>
      %c0_81 = arith.constant 0 : index
      %c0_82 = arith.constant 0 : index
      %105 = vector.load %arg26[%c0_81, %c0_82] : memref<32x32xf32, #tpu.memory_space<vmem>>, vector<32x32xf32>
      %cst_83 = arith.constant dense<0.000000e+00> : vector<4x32xf32>
      %106 = tpu.matmul %104, %105, %cst_83 {dimension_numbers = #tpu.dot_dimension_numbers<[1], [0], [0], [1], [0, 0, 1, 1], [], []>} : vector<4x32xf32>, vector<32x32xf32>, vector<4x32xf32> -> vector<4x32xf32>
      %c0_84 = arith.constant 0 : index
      %c0_85 = arith.constant 0 : index
      %107 = vector.load %arg27[%c0_84, %c0_85] : memref<1x32xf32, #tpu.memory_space<vmem>>, vector<1x32xf32>
      %108 = vector.broadcast %107 : vector<1x32xf32> to vector<4x32xf32>
      %109 = arith.addf %106, %108 : vector<4x32xf32>
      %c0_86 = arith.constant 0 : index
      %c0_87 = arith.constant 0 : index
      %c0_88 = arith.constant 0 : index
      %110 = vector.load %arg6[%c0_86, %c0_87, %c0_88] : memref<1x4x1xf32, #tpu.memory_space<vmem>>, vector<1x4x1xf32>
      %111 = vector.shape_cast %110 : vector<1x4x1xf32> to vector<4x1xf32>
      %112 = vector.broadcast %111 : vector<4x1xf32> to vector<4x32xf32>
      %113 = arith.mulf %109, %112 : vector<4x32xf32>
      %c0_89 = arith.constant 0 : index
      %c0_90 = arith.constant 0 : index
      %114 = vector.load %arg28[%c0_89, %c0_90] : memref<32x32xf32, #tpu.memory_space<vmem>>, vector<32x32xf32>
      %cst_91 = arith.constant dense<0.000000e+00> : vector<4x32xf32>
      %115 = tpu.matmul %113, %114, %cst_91 {dimension_numbers = #tpu.dot_dimension_numbers<[1], [0], [0], [1], [0, 0, 1, 1], [], []>} : vector<4x32xf32>, vector<32x32xf32>, vector<4x32xf32> -> vector<4x32xf32>
      %c0_92 = arith.constant 0 : index
      %c0_93 = arith.constant 0 : index
      %116 = vector.load %arg29[%c0_92, %c0_93] : memref<1x32xf32, #tpu.memory_space<vmem>>, vector<1x32xf32>
      %117 = vector.broadcast %116 : vector<1x32xf32> to vector<4x32xf32>
      %118 = arith.addf %115, %117 : vector<4x32xf32>
      %119 = arith.negf %118 : vector<4x32xf32>
      %120 = math.exp %119 : vector<4x32xf32>
      %cst_94 = arith.constant 1.000000e+00 : f32
      %121 = vector.broadcast %cst_94 : f32 to vector<4x32xf32>
      %122 = arith.addf %121, %120 : vector<4x32xf32>
      %123 = arith.divf %121, %122 : vector<4x32xf32>
      %124 = arith.mulf %118, %123 : vector<4x32xf32>
      %c0_95 = arith.constant 0 : index
      %c0_96 = arith.constant 0 : index
      %125 = vector.load %arg30[%c0_95, %c0_96] : memref<32x128xf32, #tpu.memory_space<vmem>>, vector<32x128xf32>
      %cst_97 = arith.constant dense<0.000000e+00> : vector<4x128xf32>
      %126 = tpu.matmul %124, %125, %cst_97 {dimension_numbers = #tpu.dot_dimension_numbers<[1], [0], [0], [1], [0, 0, 1, 1], [], []>} : vector<4x32xf32>, vector<32x128xf32>, vector<4x128xf32> -> vector<4x128xf32>
      %c0_98 = arith.constant 0 : index
      %c0_99 = arith.constant 0 : index
      %127 = vector.load %arg31[%c0_98, %c0_99] : memref<1x128xf32, #tpu.memory_space<vmem>>, vector<1x128xf32>
      %128 = vector.broadcast %127 : vector<1x128xf32> to vector<4x128xf32>
      %129 = arith.addf %126, %128 : vector<4x128xf32>
      %c0_100 = arith.constant 0 : index
      %c0_101 = arith.constant 0 : index
      %c0_102 = arith.constant 0 : index
      %130 = vector.load %arg32[%c0_100, %c0_101, %c0_102] : memref<1x4x128xf32, #tpu.memory_space<vmem>>, vector<1x4x128xf32>
      %131 = vector.shape_cast %130 : vector<1x4x128xf32> to vector<4x128xf32>
      %132 = vector.shape_cast %129 : vector<4x128xf32> to vector<1x4x128xf32>
      tpu.vector_store %arg32[%c0_100, %c0_101, %c0_102], %132 {strides = array<i32>} : memref<1x4x128xf32, #tpu.memory_space<vmem>>, vector<1x4x128xf32>,
    } else {
    }
    return
  }
  func.func @transform_0(%arg0: i32, %arg1: i32) -> (i32, i32, i32) {
    %c0_i32 = arith.constant 0 : i32
    %c0_i32_0 = arith.constant 0 : i32
    %c0_i32_1 = arith.constant 0 : i32
    return %arg0, %c0_i32, %c0_i32_0 : i32, i32, i32
  }
  func.func @transform_1(%arg0: i32, %arg1: i32) -> (i32, i32, i32) {
    %c0_i32 = arith.constant 0 : i32
    %c0_i32_0 = arith.constant 0 : i32
    %c0_i32_1 = arith.constant 0 : i32
    return %arg0, %c0_i32, %c0_i32_0 : i32, i32, i32
  }
  func.func @transform_2(%arg0: i32, %arg1: i32) -> (i32, i32, i32) {
    %c0_i32 = arith.constant 0 : i32
    %c0_i32_0 = arith.constant 0 : i32
    %c0_i32_1 = arith.constant 0 : i32
    return %arg0, %c0_i32, %c0_i32_0 : i32, i32, i32
  }
  func.func @transform_3(%arg0: i32, %arg1: i32) -> (i32, i32, i32) {
    %c0_i32 = arith.constant 0 : i32
    %c0_i32_0 = arith.constant 0 : i32
    %c0_i32_1 = arith.constant 0 : i32
    return %arg0, %c0_i32, %c0_i32_0 : i32, i32, i32
  }
  func.func @transform_4(%arg0: i32, %arg1: i32) -> (i32, i32, i32) {
    %c0_i32 = arith.constant 0 : i32
    %c0_i32_0 = arith.constant 0 : i32
    %c0_i32_1 = arith.constant 0 : i32
    return %arg0, %c0_i32, %c0_i32_0 : i32, i32, i32
  }
  func.func @transform_5(%arg0: i32, %arg1: i32) -> (i32, i32, i32) {
    %c0_i32 = arith.constant 0 : i32
    %c0_i32_0 = arith.constant 0 : i32
    %c0_i32_1 = arith.constant 0 : i32
    return %arg0, %c0_i32, %c0_i32_0 : i32, i32, i32
  }
  func.func @transform_6(%arg0: i32, %arg1: i32) -> (i32, i32, i32) {
    %c0_i32 = arith.constant 0 : i32
    %c0_i32_0 = arith.constant 0 : i32
    %c0_i32_1 = arith.constant 0 : i32
    return %arg0, %c0_i32, %c0_i32_0 : i32, i32, i32
  }
  func.func @transform_7(%arg0: i32, %arg1: i32) -> (i32, i32, i32) {
    %c0_i32 = arith.constant 0 : i32
    %c0_i32_0 = arith.constant 0 : i32
    %c0_i32_1 = arith.constant 0 : i32
    return %arg1, %c0_i32, %c0_i32_0 : i32, i32, i32
  }
  func.func @transform_8(%arg0: i32, %arg1: i32) -> (i32, i32, i32) {
    %c0_i32 = arith.constant 0 : i32
    %c0_i32_0 = arith.constant 0 : i32
    %c0_i32_1 = arith.constant 0 : i32
    return %arg1, %c0_i32, %c0_i32_0 : i32, i32, i32
  }
  func.func @transform_9(%arg0: i32, %arg1: i32) -> (i32, i32, i32) {
    %c0_i32 = arith.constant 0 : i32
    %c0_i32_0 = arith.constant 0 : i32
    %c0_i32_1 = arith.constant 0 : i32
    return %arg1, %c0_i32, %c0_i32_0 : i32, i32, i32
  }
  func.func @transform_10(%arg0: i32, %arg1: i32) -> (i32, i32, i32) {
    %c0_i32 = arith.constant 0 : i32
    %c0_i32_0 = arith.constant 0 : i32
    %c0_i32_1 = arith.constant 0 : i32
    return %arg1, %c0_i32, %c0_i32_0 : i32, i32, i32
  }
  func.func @transform_11(%arg0: i32, %arg1: i32) -> (i32, i32, i32) {
    %c0_i32 = arith.constant 0 : i32
    %c0_i32_0 = arith.constant 0 : i32
    %c0_i32_1 = arith.constant 0 : i32
    return %arg1, %c0_i32, %c0_i32_0 : i32, i32, i32
  }
  func.func @transform_12(%arg0: i32, %arg1: i32) -> (i32, i32, i32) {
    %c0_i32 = arith.constant 0 : i32
    %c0_i32_0 = arith.constant 0 : i32
    %c0_i32_1 = arith.constant 0 : i32
    return %arg1, %c0_i32, %c0_i32_0 : i32, i32, i32
  }
  func.func @transform_13(%arg0: i32, %arg1: i32) -> (i32, i32, i32) {
    %c0_i32 = arith.constant 0 : i32
    %c0_i32_0 = arith.constant 0 : i32
    %c0_i32_1 = arith.constant 0 : i32
    return %arg1, %c0_i32, %c0_i32_0 : i32, i32, i32
  }
  func.func @transform_14(%arg0: i32, %arg1: i32) -> (i32, i32, i32) {
    %c0_i32 = arith.constant 0 : i32
    %c0_i32_0 = arith.constant 0 : i32
    %c0_i32_1 = arith.constant 0 : i32
    return %arg1, %c0_i32, %c0_i32_0 : i32, i32, i32
  }
  func.func @transform_15(%arg0: i32, %arg1: i32) -> (i32, i32, i32) {
    %c0_i32 = arith.constant 0 : i32
    %c0_i32_0 = arith.constant 0 : i32
    %c0_i32_1 = arith.constant 0 : i32
    return %arg1, %c0_i32, %c0_i32_0 : i32, i32, i32
  }
  func.func @transform_16(%arg0: i32, %arg1: i32) -> (i32, i32, i32) {
    %c0_i32 = arith.constant 0 : i32
    %c0_i32_0 = arith.constant 0 : i32
    %c0_i32_1 = arith.constant 0 : i32
    return %arg1, %c0_i32, %c0_i32_0 : i32, i32, i32
  }
  func.func @transform_17(%arg0: i32, %arg1: i32) -> (i32, i32, i32) {
    %c0_i32 = arith.constant 0 : i32
    %c0_i32_0 = arith.constant 0 : i32
    %c0_i32_1 = arith.constant 0 : i32
    return %arg1, %c0_i32, %c0_i32_0 : i32, i32, i32
  }
  func.func @transform_18(%arg0: i32, %arg1: i32) -> (i32, i32, i32) {
    %c0_i32 = arith.constant 0 : i32
    %c0_i32_0 = arith.constant 0 : i32
    %c0_i32_1 = arith.constant 0 : i32
    return %arg1, %c0_i32, %c0_i32_0 : i32, i32, i32
  }
  func.func @transform_19(%arg0: i32, %arg1: i32) -> (i32, i32, i32) {
    %c0_i32 = arith.constant 0 : i32
    %c0_i32_0 = arith.constant 0 : i32
    %c0_i32_1 = arith.constant 0 : i32
    return %arg1, %c0_i32, %c0_i32_0 : i32, i32, i32
  }
  func.func @transform_20(%arg0: i32, %arg1: i32) -> (i32, i32) {
    %c0_i32 = arith.constant 0 : i32
    %c0_i32_0 = arith.constant 0 : i32
    %c0_i32_1 = arith.constant 0 : i32
    return %c0_i32, %c0_i32_0 : i32, i32
  }
  func.func @transform_21(%arg0: i32, %arg1: i32) -> (i32, i32) {
    %c0_i32 = arith.constant 0 : i32
    %c0_i32_0 = arith.constant 0 : i32
    %c0_i32_1 = arith.constant 0 : i32
    return %c0_i32, %c0_i32_0 : i32, i32
  }
  func.func @transform_22(%arg0: i32, %arg1: i32) -> (i32, i32) {
    %c0_i32 = arith.constant 0 : i32
    %c0_i32_0 = arith.constant 0 : i32
    %c0_i32_1 = arith.constant 0 : i32
    return %c0_i32, %c0_i32_0 : i32, i32
  }
  func.func @transform_23(%arg0: i32, %arg1: i32) -> (i32, i32) {
    %c0_i32 = arith.constant 0 : i32
    %c0_i32_0 = arith.constant 0 : i32
    %c0_i32_1 = arith.constant 0 : i32
    return %c0_i32, %c0_i32_0 : i32, i32
  }
  func.func @transform_24(%arg0: i32, %arg1: i32) -> (i32, i32) {
    %c0_i32 = arith.constant 0 : i32
    %c0_i32_0 = arith.constant 0 : i32
    %c0_i32_1 = arith.constant 0 : i32
    return %c0_i32, %c0_i32_0 : i32, i32
  }
  func.func @transform_25(%arg0: i32, %arg1: i32) -> (i32, i32) {
    %c0_i32 = arith.constant 0 : i32
    %c0_i32_0 = arith.constant 0 : i32
    %c0_i32_1 = arith.constant 0 : i32
    return %c0_i32, %c0_i32_0 : i32, i32
  }
  func.func @transform_26(%arg0: i32, %arg1: i32) -> (i32, i32) {
    %c0_i32 = arith.constant 0 : i32
    %c0_i32_0 = arith.constant 0 : i32
    %c0_i32_1 = arith.constant 0 : i32
    return %c0_i32, %c0_i32_0 : i32, i32
  }
  func.func @transform_27(%arg0: i32, %arg1: i32) -> (i32, i32) {
    %c0_i32 = arith.constant 0 : i32
    %c0_i32_0 = arith.constant 0 : i32
    %c0_i32_1 = arith.constant 0 : i32
    return %c0_i32, %c0_i32_0 : i32, i32
  }
  func.func @transform_28(%arg0: i32, %arg1: i32) -> (i32, i32) {
    %c0_i32 = arith.constant 0 : i32
    %c0_i32_0 = arith.constant 0 : i32
    %c0_i32_1 = arith.constant 0 : i32
    return %c0_i32, %c0_i32_0 : i32, i32
  }
  func.func @transform_29(%arg0: i32, %arg1: i32) -> (i32, i32) {
    %c0_i32 = arith.constant 0 : i32
    %c0_i32_0 = arith.constant 0 : i32
    %c0_i32_1 = arith.constant 0 : i32
    return %c0_i32, %c0_i32_0 : i32, i32
  }
  func.func @transform_30(%arg0: i32, %arg1: i32) -> (i32, i32, i32) {
    %c0_i32 = arith.constant 0 : i32
    %c0_i32_0 = arith.constant 0 : i32
    %c0_i32_1 = arith.constant 0 : i32
    return %arg0, %c0_i32, %c0_i32_0 : i32, i32, i32
  }
}

</mosaic_0001>

<bundles_post_ra>
// kernel: tpu_custom_call.1
= control target key start
LH: loop header
LB: loop body
LE: loop exit
PB: predicated region body
PF: predicated region fallthrough
CT: control target
= control target key end

     0   :  { %s3157_s6 = smov 1   ;;  %s3158_s10 = smov 2   ;;  %s3808_s0 = inlined_call_operand.smem [shape: u32[31], index: -1, kind: input, shape index: {}] }
   0x1   :  { %s3199_s5 = sld [smem:[%s3808_s0]]   ;;  %s3159_s14 = smov 3  }
   0x2   :  { %s3204_s9 = sld [smem:[%s3808_s0 + %s3157_s6]]   ;;  %s3160_s18 = smov 4  }
   0x3   :  { %s3209_s13 = sld [smem:[%s3808_s0 + %s3158_s10]]   ;;  %s3161_s22 = smov 5  }
   0x4   :  { %s3214_s17 = sld [smem:[%s3808_s0 + %s3159_s14]]   ;;  %s3162_s26 = smov 6  }
   0x5   :  { %s3219_s21 = sld [smem:[%s3808_s0 + %s3160_s18]]   ;;  %s3163_s30 = smov 7  }
   0x6   :  { %s3224_s25 = sld [smem:[%s3808_s0 + %s3161_s22]]   ;;  %s3164_s4 = smov 8  }
   0x7   :  { %3839 = sst [smem:[#allocation20_spill]] %s3199_s5  ;;  %s3165_s10 = smov 9  }
   0x8   :  { %3840 = sst [smem:[#allocation21_spill]] %s3204_s9  ;;  %s3166_s15 = smov 10  }
   0x9   :  { %3841 = sst [smem:[#allocation22_spill]] %s3209_s13  ;;  %s3167_s20 = smov 11  }
   0xa   :  { %3842 = sst [smem:[#allocation23_spill]] %s3214_s17  ;;  %s3169_s1 = smov 13  }
   0xb   :  { %3843 = sst [smem:[#allocation24_spill]] %s3219_s21  ;;  %s3170_s7 = smov 14  }
   0xc   :  { %3844 = sst [smem:[#allocation25_spill]] %s3224_s25  ;;  %s3172_s22 = smov 16  }
   0xd   :  { %s3229_s29 = sld [smem:[%s3808_s0 + %s3162_s26]]   ;;  %s3168_s26 = smov 12  }
   0xe   :  { %s3234_s3 = sld [smem:[%s3808_s0 + %s3163_s30]]   ;;  %s3173_s28 = smov 17  }
   0xf   :  { %s3239_s8 = sld [smem:[%s3808_s0 + %s3164_s4]]  }
  0x10   :  { %s3244_s14 = sld [smem:[%s3808_s0 + %s3165_s10]]  }
  0x11   :  { %s3249_s19 = sld [smem:[%s3808_s0 + %s3166_s15]]   ;;  %s3171_s15 = smov 15  }
  0x12   :  { %s3254_s24 = sld [smem:[%s3808_s0 + %s3167_s20]]  }
  0x13   :  { %3845 = sst [smem:[#allocation26_spill]] %s3229_s29 }
  0x14   :  { %3846 = sst [smem:[#allocation27_spill]] %s3234_s3 }
  0x15   :  { %3847 = sst [smem:[#allocation28_spill]] %s3239_s8 }
  0x16   :  { %3848 = sst [smem:[#allocation29_spill]] %s3244_s14 }
  0x17   :  { %3849 = sst [smem:[#allocation30_spill]] %s3249_s19 }
  0x18   :  { %3850 = sst [smem:[#allocation31_spill]] %s3254_s24 }
  0x19   :  { %s3259_s30 = sld [smem:[%s3808_s0 + %s3168_s26]]  }
  0x1a   :  { %s3264_s6 = sld [smem:[%s3808_s0 + %s3169_s1]]  }
  0x1b   :  { %s3269_s12 = sld [smem:[%s3808_s0 + %s3170_s7]]   ;;  %s3174_s7 = smov 18  }
  0x1c   :  { %s3274_s20 = sld [smem:[%s3808_s0 + %s3171_s15]]   ;;  %s3175_s15 = smov 19  }
  0x1d   :  { %s3279_s27 = sld [smem:[%s3808_s0 + %s3172_s22]]   ;;  %s3176_s22 = smov 20  }
  0x1e   :  { %s3284_s4 = sld [smem:[%s3808_s0 + %s3173_s28]]   ;;  %s3177_s28 = smov 21  }
  0x1f   :  { %3851 = sst [smem:[#allocation32_spill]] %s3259_s30 }
  0x20   :  { %3852 = sst [smem:[#allocation33_spill]] %s3264_s6 }
  0x21   :  { %3853 = sst [smem:[#allocation34_spill]] %s3269_s12 }
  0x22   :  { %3854 = sst [smem:[#allocation35_spill]] %s3274_s20 }
  0x23   :  { %3855 = sst [smem:[#allocation36_spill]] %s3279_s27 }
  0x24   :  { %3856 = sst [smem:[#allocation37_spill]] %s3284_s4 }
  0x25   :  { %s3289_s6 = sld [smem:[%s3808_s0 + %s3174_s7]]   ;;  %s3178_s7 = smov 22  }
  0x26   :  { %s3294_s24 = sld [smem:[%s3808_s0 + %s3175_s15]]   ;;  %s3179_s15 = smov 23  }
  0x27   :  { %s3299_s27 = sld [smem:[%s3808_s0 + %s3176_s22]]   ;;  %s3180_s22 = smov 24  }
  0x28   :  { %s3304_s4 = sld [smem:[%s3808_s0 + %s3177_s28]]   ;;  %s3181_s28 = smov 25  }
  0x29   :  { %s3309_s19 = sld [smem:[%s3808_s0 + %s3178_s7]]   ;;  %s3182_s7 = smov 26  }
  0x2b   :  { %3857 = sst [smem:[#allocation38_spill]] %s3289_s6 }
  0x2c   :  { %3858 = sst [smem:[#allocation39_spill]] %s3294_s24 }
  0x2d   :  { %3859 = sst [smem:[#allocation40_spill]] %s3299_s27 }
  0x2e   :  { %3860 = sst [smem:[#allocation41_spill]] %s3304_s4 }
  0x2f   :  { %3861 = sst [smem:[#allocation42_spill]] %s3309_s19 }
  0x30   :  { %s3314_s24 = sld [smem:[%s3808_s0 + %s3179_s15]]   ;;  %s3183_s15 = smov 27  }
  0x31   :  { %s3319_s27 = sld [smem:[%s3808_s0 + %s3180_s22]]   ;;  %s3184_s22 = smov 28  }
  0x32   :  { %s3324_s4 = sld [smem:[%s3808_s0 + %s3181_s28]]   ;;  %s3185_s28 = smov 29  }
  0x33   :  { %s3329_s19 = sld [smem:[%s3808_s0 + %s3182_s7]]   ;;  %s3186_s7 = smov 30  }
  0x36   :  { %3862 = sst [smem:[#allocation43_spill]] %s3314_s24 }
  0x37   :  { %3863 = sst [smem:[#allocation44_spill]] %s3319_s27 }
  0x38   :  { %3864 = sst [smem:[#allocation45_spill]] %s3324_s4 }
  0x39   :  { %3865 = sst [smem:[#allocation46_spill]] %s3329_s19 }
  0x3a   :  { %s3334_s24 = sld [smem:[%s3808_s0 + %s3183_s15]]  }
  0x3b   :  { %s3339_s27 = sld [smem:[%s3808_s0 + %s3184_s22]]  }
  0x3c   :  { %s3344_s4 = sld [smem:[%s3808_s0 + %s3185_s28]]  }
  0x3d   :  { %s3349_s19 = sld [smem:[%s3808_s0 + %s3186_s7]]  }
  0x40   :  { %3866 = sst [smem:[#allocation47_spill]] %s3334_s24 }
  0x41   :  { %3867 = sst [smem:[#allocation48_spill]] %s3339_s27 }
  0x42   :  { %3868 = sst [smem:[#allocation49_spill]] %s3344_s4 }
  0x43   :  { %3869 = sst [smem:[#allocation50_spill]] %s3349_s19 }
  0x44   :  { %66 = vsyncpa [#allocation4], 0 }
  0x45   :  { %68 = vsyncpa [#allocation4 + $0x1], 0 }
  0x46   :  { %69 = vsyncpa [#allocation7], 0 }
  0x47   :  { %71 = vsyncpa [#allocation7 + $0x1], 0 }
  0x48   :  { %72 = vsyncpa [#allocation10], 0 }
  0x49   :  { %74 = vsyncpa [#allocation10 + $0x1], 0 }
  0x4a   :  { %75 = vsyncpa [#allocation13], 0 }
  0x4b   :  { %77 = vsyncpa [#allocation13 + $0x1], 0 }
  0x4c   :  { %78 = vsyncpa [#allocation5], 0 }
  0x4d   :  { %80 = vsyncpa [#allocation5 + $0x1], 0  ;;  %s3351_s15 = smov 0   ;;  %s3353_s16 = smov 0  }
  0x4e   :  { %s3355_s18 = smov 0   ;;  %s3357_s22 = smov 0  }
  0x4f   :  { %s3359_s0 = smov 0   ;;  %s3361_s23 = smov 0  }
  0x50   :  { %s3363_s26 = smov 0   ;;  %s3365_s28 = smov 0  }
  0x51   :  { %s3367_s1 = smov 0   ;;  %s3369_s2 = smov 0  }
  0x52   :  { %s3371_s7 = smov 0  }
  0x53 LB: > { %s3870_s30 = sld [smem:[#allocation32_spill]]  ;;  %s3405_s10 = sadd.s32 4294967295, %s3155_s7   ;;  %s3135_s23 = sphi %s3361_s23, %s3949_s23   ;;  %s3131_s0 = sphi %s3359_s0, %s3948_s0   ;;  %s3127_s22 = sphi %s3357_s22, %s3947_s22   ;;  %s3123_s18 = sphi %s3355_s18, %s3946_s18   ;;  %s3119_s16 = sphi %s3353_s16, %s3945_s16   ;;  %s3115_s15 = sphi %s3351_s15, %s3944_s15   ;;  %s3155_s7 = sphi %s3371_s7, %s86_s7   ;;  %s3151_s2 = sphi %s3369_s2, %s3953_s2   ;;  %s3147_s1 = sphi %s3367_s1, %s3952_s1   ;;  %s3143_s28 = sphi %s3365_s28, %s3951_s28   ;;  %s3139_s26 = sphi %s3363_s26, %s3950_s26  }
  0x54   : > { %s3871_s20 = sld [smem:[#allocation35_spill]]  ;;  %s2543_s11 = sadd.s32 4294967294, %s3155_s7  }
  0x55   : > { %s3872_s6 = sld [smem:[#allocation38_spill]]  ;;  %s95_s19 = sadd.s32 1, %s3147_s1 }
  0x56   : > { %s3873_s3 = sld [smem:[#allocation27_spill]]  ;;  %s98_s4 = sadd.s32 1, %s3151_s2 }
  0x57   : > { %s3874_s12 = sld [smem:[#allocation34_spill]]  ;;  %p96_p0 = scmp.ge.s32.totalorder %s95_s19, 4 }
  0x58   : > { %s3875_s8 = sld [smem:[#allocation28_spill]]  ;;  %s287_s24 = sadd.s32 1, %s3135_s23 }
  0x59   : > { %3876 = sst [smem:[#allocation51_spill]] %s3115_s15  ;;  %p294_p1 = scmp.ne.s32.totalorder %s3135_s23, %s3131_s0 }
  0x5a   : > { %3877 = sst [smem:[#allocation52_spill]] %s3119_s16  ;;  %p295_p2 = scmp.eq.s32.totalorder %s3155_s7, 0 }
  0x5b   : > { %3878 = sst [smem:[#allocation53_spill]] %s3123_s18  ;;  %s3955_s19 = smov (%p96_p0, %s95_s19), 0 }
  0x5c   : > { %3879 = sst [smem:[#allocation54_spill]] %s3131_s0  ;;  %s3957_s4 = smov (!%p96_p0, %s98_s4), %s3151_s2 }
  0x5d   : > { %3880 = sst [smem:[#allocation55_spill]] %s3135_s23  ;;  %s284_s27 = ssub.s32 %s3147_s1, %s3955_s19 }
  0x5e   : > { %3881 = sst [smem:[#allocation56_spill]] %s3143_s28  ;;  %p3419_p3 = por %p295_p2, %p294_p1 }
  0x5f   : > { %3882 = sst [smem:[#allocation57_spill]] %s3147_s1  ;;  %p100_p4 = scmp.ge.s32.totalorder %s3957_s4, 2 }
  0x60   : > { %3883 = sst [smem:[#allocation58_spill]] %s3151_s2  ;;  %p285_p5 = scmp.eq.s32.totalorder %s284_s27, 0 }
  0x61   : > { %3884 = sst [smem:[#allocation59_spill]] %s3155_s7  ;;  %p300_p6 = scmp.ne.s32.totalorder %s3131_s0, %s3127_s22 }
  0x62   : > { %3885 = sst [smem:[#allocation60_spill]] %s3955_s19  ;;  %p301_p7 = scmp.eq.s32.totalorder %s3405_s10, 0 }
  0x63   : > { %s3959_s4 = smov (%p100_p4, %s3957_s4), 0  ;;  %s835_s21 = sadd.s32 1, %s3123_s18 }
  0x64   : > { %3887 = sst [smem:[#allocation61_spill]] %s3959_s4  ;;  %p3430_p8 = por %p301_p7, %p300_p6 }
  0x65   : > { %s3428_s29 = scalar_select %p285_p5, %s3135_s23, %s287_s24  }
  0x66   : > { %s832_s25 = ssub.s32 %s3151_s2, %s3959_s4  ;;  %p845_p10 = scmp.ne.s32.totalorder %s3123_s18, %s3119_s16 }
  0x67   : > { %3888 = sst [smem:[#allocation62_spill]] %s3428_s29  ;;  %p833_p9 = scmp.eq.s32.totalorder %s832_s25, 0 }
  0x68   : > { %p846_p11 = scmp.eq.s32.totalorder %s3405_s10, 7  ;;  %p851_p13 = scmp.ne.s32.totalorder %s3119_s16, %s3115_s15 }
  0x69   : > { %s3441_s27 = scalar_select %p833_p9, %s3123_s18, %s835_s21  }
  0x6a   : > { %p3443_p12 = por %p846_p11, %p845_p10  ;;  %p852_p0 = scmp.eq.s32.totalorder %s2543_s11, 7 }
  0x6b   : > { %3890 = sst [smem:[#allocation63_spill]] %s3441_s27  ;;  %p2675_p1 = scmp.lt.s32.totalorder %s3155_s7, 8 }
  0x6c   : > { %s3891_s22 = scalar_select %p3443_p12, 1, 0 }
  0x6d   : > { %s3451_s24 = sand.u32 1, %s3135_s23   ;;  %p3453_p2 = por %p852_p0, %p851_p13 }
  0x6e   : > { %3892 = sst [smem:[#allocation64_spill]] %s3891_s22  ;;  %s3458_s25 = sshll.u32 %s3451_s24, 5 }
  0x6f   : > { %s3893_s4 = scalar_select %p3453_p2, 1, 0 }
  0x70   : > { %s3461_s21 = sshll.u32 %s3147_s1, 5  ;;  %p3465_p4 = pnand %p2675_p1, %p3419_p3 }
  0x71   : > { %3894 = sst [smem:[#allocation65_spill]] %s3893_s4  ;;  %s3822_s11 = sand.u32 1, %s3155_s7  }
  0x72   : > { %s987_s29 = scalar_lea.hbm %s3875_s8, %s3461_s21  ;;  %s982_s23 = scalar_lea.vmem [#allocation6], %s3458_s25 }
  0x73   : > { %s990_s27 = sshll.u32 %s982_s23, 4  ;;  %s988_s18 = sshll.u32 %s987_s29, 4  ;;  %s991_s27 = int_to_ptr.vmem [resolvable:$true] %s990_s27  ;;  %s989_s18 = int_to_ptr.hbm [resolvable:$true] %s988_s18 }
  0x74   : > { %p2564_p5 = scmp.ge.s32.totalorder %s3155_s7, 1  ;;  %s3476_s1 = scalar_lea.sflag [#allocation7], %s3822_s11 }
  0x75   : > { %s2841_s14 = sshra.s32 %s989_s18, 4  ;;  %p3480_p6 = pneg %p3465_p4  ;;  %s2842_s14 = int_to_ptr.hbm [resolvable:$true] %s2841_s14 }
  0x76   : > { %s2843_s4 = scalar_lea.hbm %s2842_s14, 32  ;;  %s2848_s29 = scalar_lea.hbm %s3875_s8, 128 }
  0x77   : > { %p2844_p3 = scmp.ne.s32.totalorder %s2842_s14, %s2843_s4  ;;  %p2849_p10 = scmp.lt.s32.totalorder %s2842_s14, %s3875_s8 }
  0x78   : > { %p2850_p11 = scmp.lt.s32.totalorder %s2848_s29, %s2843_s4 }
  0x79   : > { %p2846_p7 = pnand %p3480_p6, %p2844_p3 }
  0x7a   : > { %p2851_p13 = por %p2850_p11, %p2849_p10 }
  0x7b   : > { %p2847_p9 = pneg %p2846_p7 }
  0x7d   : > { %p2852_p0 = pnand %p2851_p13, %p2847_p9 }
  0x7f   : > { %2855 = shalt.err (!%p2852_p0)
}
  0x80   : > { %s3187_s23 = smov 128   ;;  %s3188_s11 = smov 8  }
  0x81   : > { %2658 = dma.hbm_to_vmem [thread:$0]  (!%p3465_p4), %s989_s18, 512, %s991_s27, %s3476_s1, %s3187_s23, %s3187_s23, %s3188_s11  }
  0x82   : > { %p1130_p1 = scmp.lt.s32.totalorder %s3155_s7, 9  ;;  %s1056_s4 = scalar_lea.hbm %s3874_s12, %s3461_s21 }
  0x83   : > { %s1057_s29 = sshll.u32 %s1056_s4, 4  ;;  %s1051_s8 = scalar_lea.vmem [#allocation9], %s3458_s25  ;;  %s1058_s29 = int_to_ptr.hbm [resolvable:$true] %s1057_s29 }
  0x84   : > { %p3499_p3 = pnand %p2564_p5, %p1130_p1  ;;  %s1059_s22 = sshll.u32 %s1051_s8, 4  ;;  %s1060_s22 = int_to_ptr.vmem [resolvable:$true] %s1059_s22 }
  0x85   : > { %s3898_s17 = sand.u32 1, %s3155_s7   ;;  %s2871_s9 = sshra.s32 %s1058_s29, 4  ;;  %s2872_s9 = int_to_ptr.hbm [resolvable:$true] %s2871_s9 }
  0x86   : > { %s3506_s13 = scalar_lea.sflag [#allocation10], %s3898_s17  ;;  %s2873_s18 = scalar_lea.hbm %s2872_s9, 32 }
  0x87   : > { %p2874_p7 = scmp.ne.s32.totalorder %s2872_s9, %s2873_s18  ;;  %s2878_s27 = scalar_lea.hbm %s3874_s12, 128 }
  0x88   : > { %p2879_p5 = scmp.lt.s32.totalorder %s2872_s9, %s3874_s12  ;;  %p2880_p11 = scmp.lt.s32.totalorder %s2878_s27, %s2873_s18 }
  0x89   : > { %p2876_p9 = pnand %p2874_p7, %p3480_p6 }
  0x8a   : > { %p2881_p13 = por %p2880_p11, %p2879_p5 }
  0x8b   : > { %p2877_p10 = pneg %p2876_p9 }
  0x8d   : > { %p2882_p0 = pnand %p2881_p13, %p2877_p10 }
  0x8f   : > { %2885 = shalt.err (!%p2882_p0)
}
  0x90   : > { %2664 = dma.hbm_to_vmem [thread:$0]  (!%p3465_p4), %s1058_s29, 512, %s1060_s22, %s3506_s13, %s3187_s23, %s3187_s23, %s3188_s11  }
  0x91   : > { %s965_s17 = scalar_lea.hbm %s3873_s3, %s3461_s21  ;;  %s960_s8 = scalar_lea.vmem [#allocation3], %s3458_s25 }
  0x92   : > { %s966_s9 = sshll.u32 %s965_s17, 4  ;;  %s968_s4 = sshll.u32 %s960_s8, 4  ;;  %s967_s9 = int_to_ptr.hbm [resolvable:$true] %s966_s9  ;;  %s969_s4 = int_to_ptr.vmem [resolvable:$true] %s968_s4 }
  0x93   : > { %s957_s18 = scalar_lea.sflag [#allocation4], %s3451_s24  ;;  %s2901_s27 = sshra.s32 %s967_s9, 4  ;;  %s2902_s27 = int_to_ptr.hbm [resolvable:$true] %s2901_s27 }
  0x94   : > { %s2903_s12 = scalar_lea.hbm %s2902_s27, 32  ;;  %s2908_s7 = scalar_lea.hbm %s3873_s3, 128 }
  0x95   : > { %p2904_p1 = scmp.ne.s32.totalorder %s2902_s27, %s2903_s12  ;;  %p2909_p10 = scmp.lt.s32.totalorder %s2902_s27, %s3873_s3 }
  0x96   : > { %p2910_p5 = scmp.lt.s32.totalorder %s2908_s7, %s2903_s12 }
  0x97   : > { %p2906_p7 = pnand %p2904_p1, %p3480_p6 }
  0x98   : > { %p2911_p11 = por %p2910_p5, %p2909_p10 }
  0x99   : > { %p2907_p9 = pneg %p2906_p7 }
  0x9b   : > { %p2912_p13 = pnand %p2911_p11, %p2907_p9 }
  0x9d   : > { %2915 = shalt.err (!%p2912_p13)
}
  0x9e   : > { %2655 = dma.hbm_to_vmem [thread:$0]  (!%p3465_p4), %s967_s9, 512, %s969_s4, %s957_s18, %s3187_s23, %s3187_s23, %s3188_s11  }
  0x9f   : > { %s1028_s22 = scalar_lea.hbm %s3870_s30, %s3461_s21  ;;  %s1023_s17 = scalar_lea.vmem [#allocation8], %s3458_s25 }
  0xa0   : > { %s1029_s29 = sshll.u32 %s1028_s22, 4  ;;  %s1031_s8 = sshll.u32 %s1023_s17, 4  ;;  %s1030_s29 = int_to_ptr.hbm [resolvable:$true] %s1029_s29  ;;  %s1032_s8 = int_to_ptr.vmem [resolvable:$true] %s1031_s8 }
  0xa1   : > { %s2931_s12 = sshra.s32 %s1030_s29, 4  ;;  %s2938_s27 = scalar_lea.hbm %s3870_s30, 128  ;;  %s2932_s12 = int_to_ptr.hbm [resolvable:$true] %s2931_s12 }
  0xa2   : > { %s2933_s7 = scalar_lea.hbm %s2932_s12, 32  ;;  %p2939_p9 = scmp.lt.s32.totalorder %s2932_s12, %s3870_s30 }
  0xa3   : > { %p2934_p0 = scmp.ne.s32.totalorder %s2932_s12, %s2933_s7  ;;  %p2940_p10 = scmp.lt.s32.totalorder %s2938_s27, %s2933_s7 }
  0xa5   : > { %p2936_p1 = pnand %p2934_p0, %p3480_p6  ;;  %p2941_p5 = por %p2940_p10, %p2939_p9 }
  0xa7   : > { %p2937_p7 = pneg %p2936_p1 }
  0xa9   : > { %p2942_p11 = pnand %p2941_p5, %p2937_p7 }
  0xab   : > { %2945 = shalt.err (!%p2942_p11)
}
  0xac   : > { %2661 = dma.hbm_to_vmem [thread:$0]  (!%p3465_p4), %s1030_s29, 512, %s1032_s8, %s3476_s1, %s3187_s23, %s3187_s23, %s3188_s11  }
  0xad   : > { %s1078_s9 = scalar_lea.hbm %s3871_s20, %s3461_s21  ;;  %s1073_s18 = scalar_lea.vmem [#allocation11], %s3458_s25 }
  0xae   : > { %s1079_s4 = sshll.u32 %s1078_s9, 4  ;;  %s1081_s22 = sshll.u32 %s1073_s18, 4  ;;  %s1080_s4 = int_to_ptr.hbm [resolvable:$true] %s1079_s4  ;;  %s1082_s22 = int_to_ptr.vmem [resolvable:$true] %s1081_s22 }
  0xaf   : > { %s2961_s17 = sshra.s32 %s1080_s4, 4  ;;  %s2968_s7 = scalar_lea.hbm %s3871_s20, 128  ;;  %s2962_s17 = int_to_ptr.hbm [resolvable:$true] %s2961_s17 }
  0xb0   : > { %s2963_s12 = scalar_lea.hbm %s2962_s17, 32  ;;  %p2969_p7 = scmp.lt.s32.totalorder %s2962_s17, %s3871_s20 }
  0xb1   : > { %p2964_p13 = scmp.ne.s32.totalorder %s2962_s17, %s2963_s12  ;;  %p2970_p9 = scmp.lt.s32.totalorder %s2968_s7, %s2963_s12 }
  0xb3   : > { %p2966_p0 = pnand %p2964_p13, %p3480_p6  ;;  %p2971_p10 = por %p2970_p9, %p2969_p7 }
  0xb5   : > { %p2967_p1 = pneg %p2966_p0 }
  0xb7   : > { %p2972_p5 = pnand %p2971_p10, %p2967_p1 }
  0xb9   : > { %2975 = shalt.err (!%p2972_p5)
}
  0xba   : > { %2667 = dma.hbm_to_vmem [thread:$0]  (!%p3465_p4), %s1080_s4, 512, %s1082_s22, %s3506_s13, %s3187_s23, %s3187_s23, %s3188_s11  }
  0xbb   : > { %s1113_s1 = scalar_lea.hbm %s3872_s6, %s3461_s21  ;;  %s1108_s29 = scalar_lea.vmem [#allocation12], %s3458_s25 }
  0xbc   : > { %s1116_s8 = sshll.u32 %s1108_s29, 4  ;;  %s1114_s27 = sshll.u32 %s1113_s1, 4  ;;  %s1117_s8 = int_to_ptr.vmem [resolvable:$true] %s1116_s8  ;;  %s1115_s27 = int_to_ptr.hbm [resolvable:$true] %s1114_s27 }
  0xbd   : > { %s1105_s9 = scalar_lea.sflag [#allocation13], %s3451_s24  ;;  %s2991_s18 = sshra.s32 %s1115_s27, 4  ;;  %s2992_s18 = int_to_ptr.hbm [resolvable:$true] %s2991_s18 }
  0xbe   : > { %s2993_s17 = scalar_lea.hbm %s2992_s18, 32  ;;  %s2998_s12 = scalar_lea.hbm %s3872_s6, 128 }
  0xbf   : > { %p2994_p11 = scmp.ne.s32.totalorder %s2992_s18, %s2993_s17  ;;  %p2999_p1 = scmp.lt.s32.totalorder %s2992_s18, %s3872_s6 }
  0xc0   : > { %p3000_p7 = scmp.lt.s32.totalorder %s2998_s12, %s2993_s17 }
  0xc1   : > { %p2996_p13 = pnand %p2994_p11, %p3480_p6 }
  0xc2   : > { %p3001_p9 = por %p3000_p7, %p2999_p1 }
  0xc3   : > { %p2997_p0 = pneg %p2996_p13 }
  0xc5   : > { %p3002_p10 = pnand %p3001_p9, %p2997_p0 }
  0xc7   : > { %3005 = shalt.err (!%p3002_p10)
}
  0xc8   : > { %2670 = dma.hbm_to_vmem [thread:$0]  (!%p3465_p4), %s1115_s27, 512, %s1117_s8, %s1105_s9, %s3187_s23, %s3187_s23, %s3188_s11  }
  0xc9   : > { %1134 = sbr.rel (%p3499_p3) target bundleno = 1909 (0x775), region = 140 }
  0xce   : > { %s1136_s13 = sand.u32 1, %s3131_s0  }
  0xcf   : > { %s2565_s15 = sshll.u32 %s1136_s13, 5  ;;  %s1137_s24 = scalar_lea.sflag [#allocation4], %s1136_s13 }
  0xd0   : > { %s3573_s25 = scalar_lea.vmem [#allocation3], %s2565_s15 }
  0xd1   : > { %3094 = dma.done.wait (%p3430_p8), %s1137_s24, 512  }
  0xd2   : > { %3096 = vsyncadd (%p3430_p8), %s1137_s24, 4294966784  ;;  %s1146_s2 = sand.u32 1, %s3405_s10   ;;  %s3580_s11 = scalar_lea.vmem [#allocation6], %s2565_s15 }
  0xd3   : > { %s1147_s21 = scalar_lea.sflag [#allocation7], %s1146_s2 }
  0xd4   : > { %3098 = dma.done.wait (%p3430_p8), %s1147_s21, 1024  }
  0xd5   : > { %3100 = vsyncadd (%p3430_p8), %s1147_s21, 4294966272  ;;  %s3586_s23 = scalar_lea.vmem [#allocation8], %s2565_s15  ;;  %s1167_s14 = scalar_lea.sflag [#allocation10], %s1146_s2 }
  0xd6   : > { %s3588_s4 = scalar_lea.vmem [#allocation9], %s2565_s15 }
  0xd7   : > { %3899 = sst [smem:[#allocation66_spill]] %s3588_s4 }
  0xd8   : > { %3102 = dma.done.wait (%p3430_p8), %s1167_s14, 1024  }
  0xd9   : > { %3104 = vsyncadd (%p3430_p8), %s1167_s14, 4294966272  ;;  %s3594_s10 = scalar_lea.vmem [#allocation11], %s2565_s15  ;;  %s1187_s22 = scalar_lea.sflag [#allocation13], %s1136_s13 }
  0xda   : > { %s3596_s7 = scalar_lea.vmem [#allocation12], %s2565_s15 }
  0xdb   : > { %3900 = sst [smem:[#allocation67_spill]] %s3596_s7 }
  0xdc   : > { %3106 = dma.done.wait (%p3430_p8), %s1187_s22, 512  }
  0xdd   : > { %3108 = vsyncadd (%p3430_p8), %s1187_s22, 4294966784  ;;  %s3901_s5 = sld [smem:[#allocation20_spill]]  ;;  %p1349_p4 = scmp.lt.s32.totalorder %s3143_s28, 1 }
  0xde   : > { %s3902_s1 = sld [smem:[#allocation21_spill]]  ;;  %s3835_s12 = sand.u32 1, %s3119_s16  }
  0xdf   : > { %s3903_s29 = sld [smem:[#allocation22_spill]]  ;;  %s3606_s13 = sshll.u32 %s3835_s12, 2 }
  0xe0   : > { %s3904_s8 = sld [smem:[#allocation23_spill]]  ;;  %p1382_p8 = scmp.lt.s32.totalorder %s3139_s26, 3 }
  0xe1   : > { %s3905_s27 = sld [smem:[#allocation24_spill]]  ;;  %p2586_p6 = scmp.ne.s32.totalorder %s3139_s26, 0 }
  0xe2   : > { %s3906_s9 = sld [smem:[#allocation25_spill]] }
  0xe3   : > { %s3907_s18 = sld [smem:[#allocation26_spill]] }
  0xe4   : > { %s3908_s17 = sld [smem:[#allocation29_spill]] }
  0xe5   : > { %s3909_s19 = sld [smem:[#allocation30_spill]] }
  0xe6   : > { %s1350_s15 = scalar_select %p1349_p4, %s3143_s28, 1 }
  0xe7   : > { %s3910_s24 = sld [smem:[#allocation31_spill]] }
  0xe8   : > { %s3911_s2 = sld [smem:[#allocation33_spill]]  ;;  %s2572_s21 = sshll.u32 %s1350_s15, 2 }
  0xe9   : > { %s2633_s14 = sshll.u32 %s1350_s15, 4  ;;  %s3912_s22 = sld [smem:[#allocation36_spill]] }
  0xea   : > { %s1352_s3 = scalar_lea.vmem %s3901_s5, %s2572_s21  ;;  %s3913_s6 = sld [smem:[#allocation37_spill]] }
  0xeb   : > { %s3612_s20 = scalar_lea.vmem %s3902_s1, %s2633_s14  ;;  %s3914_s30 = sld [smem:[#allocation39_spill]]  ;;  %v3626_v0 = vld [vmem:[%s1352_s3] sm:$0xf] }
  0xec   : > { %s3615_s0 = scalar_lea.vmem %s3903_s29, %s2633_s14  ;;  %s3618_s7 = scalar_lea.vmem %s3904_s8, %s2633_s14 }
  0xed   : > { %s3621_s12 = scalar_lea.vmem %s3905_s27, %s2572_s21  ;;  %s3624_s16 = scalar_lea.vmem %s3906_s9, %s2633_s14 }
  0xee   : > { %3915 = sst [smem:[#allocation68_spill]] %s3621_s12  ;;  %s3629_s28 = scalar_lea.vmem %s3907_s18, %s2633_s14 }
  0xef   : > { %s3632_s15 = scalar_select %p1382_p8, %s3139_s26, 3 }
  0xf0   : > { %s1348_s5 = scalar_lea.vmem [#allocation14], %s3606_s13  ;;  %s3916_s12 = sld [smem:[#allocation40_spill]] (!%p2586_p6) }
  0xf1   : > { %s1384_s1 = scalar_lea.vmem %s3908_s17, %s3632_s15  ;;  %s2584_s29 = sshll.u32 %s3632_s15, 1 }
  0xf2   : > { %s3638_s8 = scalar_lea.vmem %s3909_s19, %s2584_s29  ;;  %s1391_s27 = scalar_lea.vmem %s3910_s24, %s3632_s15 }
  0xf3   : > { %s1394_s9 = scalar_lea.vmem %s3911_s2, %s3632_s15  ;;  %s2585_s21 = sshll.u32 %s3632_s15, 3 }
  0xf4   : > { %s3646_s3 = scalar_lea.vmem %s3912_s22, %s2585_s21  ;;  %s1401_s18 = scalar_lea.vmem %s3913_s6, %s3632_s15 }
  0xf5   : > { %s1404_s14 = scalar_lea.vmem %s3914_s30, %s3632_s15  ;;  %1409 = sbr.rel (%p2586_p6) target bundleno = 381 (0x17d), region = 168 }
  0xf6   : > { %s3917_s4 = sld [smem:[#allocation41_spill]] (!%p2586_p6) }
  0xfa   : > { %v1410_v1 = vld [vmem:[%s3916_s12] sm:$0x1f]  ;;  %vm1419_vm0 = vcmask 1044480   ;;  %vm1415_vm1 = vcmask 39936   ;;  %vm1443_vm2 = vcmask 257024  }
  0xfb   : > { %2587 = vmatpush.msk.msra.mxu0 %vm1419_vm0, %v1410_v1 }
  0xfc   : > { %2588 = vmatmul.msk.f32.vlgmr.msra.gmra.mxu0 %vm1415_vm1, %v3626_v0  ;;  %v2800_v2 = vld [vmem:[%s3917_s4] ss:$0 sm:$0xff] }
 0x179   : > { %v1440_v3 = vpop.f32.mrf.mxu0 }
 0x17a   : > { %v1441_v4 = vadd.f32 %v2800_v2, %v1440_v3 }
 0x17c   : > { %1444 = vst.msk [vmem:[#allocation2] sm:$0xf] %vm1443_vm2, %v1441_v4 }
 0x17d PF: > { %vm1455_vm3 = vcmask 1043456   ;;  %v1446_v6 = vld [vmem:[%s3624_s16] sm:$0xff]  ;;  %vm1448_vm4 = vcmask 31744   ;;  %v1519_v10 = vld [vmem:[%s3580_s11 + $0x10] sm:$0xff]  ;;  %v1518_v12 = vld [vmem:[%s3580_s11 + $0x8] sm:$0xff]  ;;  %vm1610_vm5 = vcmask 1041408  }
 0x17e   : > { %v1482_v7 = vld [vmem:[%s3629_s28] sm:$0xff]  ;;  %v1515_v11 = vld [vmem:[%s3573_s25 + $0x10] sm:$0xff]  ;;  %v1514_v13 = vld [vmem:[%s3573_s25 + $0x8] sm:$0xff]  ;;  %1776 = vxpose.xlu2.b32.start [1/2] (short) (narrow) %v1446_v6, 8  ;;  %v3189_v19 = vmov 0   ;;  %vm1603_vm6 = vcmask 15360  }
 0x17f   : > { %v1520_v8 = vld [vmem:[%s3580_s11 + $0x18] sm:$0xff]  ;;  %v1447_v14 = vld [vmem:[%s3624_s16 + $0x8] sm:$0xf]  ;;  %2801 = vset.pattern.permute.xlu0 %v3189_v19  ;;  %2802 = vset.pattern.permute.xlu1 %v3189_v19  ;;  %vm1521_vm7 = vcmask 261120   ;;  %v1687_v36 = vld [vmem:[%s3586_s23 + $0x10] sm:$0xff]  ;;  %s3921_s16 = sld [smem:[#allocation66_spill]] }
 0x180   : > { %v1516_v9 = vld [vmem:[%s3573_s25 + $0x18] sm:$0xff]  ;;  %1540 = vmatpush.msra.mxu2 %v1520_v8  ;;  %v1483_v15 = vld [vmem:[%s3629_s28 + $0x8] sm:$0xf]  ;;  %v1686_v39 = vld [vmem:[%s3586_s23 + $0x8] sm:$0xff]  ;;  %p2616_p3 = scmp.ne.s32.totalorder %s3139_s26, 3 }
 0x181   : > { %1569 = vmatpush.msra.mxu3 %v1516_v9  ;;  %v1517_v16 = vld [vmem:[%s3580_s11] sm:$0xff]  ;;  %v1602_v18 = vld [vmem:[%s3638_s8] sm:$0x3]  ;;  %s3925_s11 = sld [smem:[#allocation42_spill]] (!%p2616_p3) }
 0x182   : > { %1541 = vmatpush.msra.mxu2 %v1519_v10  ;;  %v1513_v17 = vld [vmem:[%s3573_s25] sm:$0xff]  ;;  %v2803_v28 = vld [vmem:[%s1384_s1] ss:$0 sm:$0xff]  ;;  %s3930_s17 = sld [smem:[#allocation46_spill]] (!%p2616_p3) }
 0x183   : > { %v3657_v5 = vld [vmem:[#allocation2] sm:$0xf]  ;;  %1570 = vmatpush.msra.mxu3 %v1515_v11  ;;  %v1581_v22 = vld [vmem:[%s3612_s20 + $0x8] sm:$0xf]  ;;  %s3931_s26 = sld [smem:[#allocation45_spill]] (!%p2616_p3) }
 0x184   : > { %2589 = vmatpush.msk.msra.mxu0 %vm1455_vm3, %v3657_v5  ;;  %2592 = vmatpush.msk.msra.mxu1 %vm1455_vm3, %v3657_v5  ;;  %v1580_v20 = vld [vmem:[%s3612_s20] sm:$0xff]  ;;  %v1601_v23 = vld [vmem:[%s3615_s0 + $0x8] sm:$0xf]  ;;  %s3932_s12 = sld [smem:[#allocation48_spill]] (!%p2616_p3) }
 0x185   : > { %2590 = vmatmul.msk.f32.vlgmr.msra.gmra.mxu0 %vm1448_vm4, %v1446_v6  ;;  %2593 = vmatmul.msk.f32.vlgmr.msra.gmra.mxu1 %vm1448_vm4, %v1482_v7  ;;  %v1600_v21 = vld [vmem:[%s3615_s0] sm:$0xff]  ;;  %v1763_v53 = vld [vmem:[%s3618_s7 + $0x8] sm:$0xf]  ;;  %s3922_s0 = sld [smem:[#allocation67_spill]] }
 0x186   : > { %1542 = vmatpush.msra.mxu2 %v1518_v12  ;;  %1571 = vmatpush.msra.mxu3 %v1514_v13  ;;  %v1688_v32 = vld [vmem:[%s3586_s23 + $0x18] sm:$0xff]  ;;  %v1685_v41 = vld [vmem:[%s3586_s23] sm:$0xff]  ;;  %s3926_s23 = sld [smem:[#allocation44_spill]] (!%p2616_p3) }
 0x187   : > { %1777 = vxpose.xlu2.b32.end [2/2] (short) (narrow) %v1447_v14, 8  ;;  %2599 = vmatpush.msk.msrb.mxu0 %vm1610_vm5, %v1602_v18  ;;  %v2804_v38 = vld [vmem:[%s1391_s27] ss:$0 sm:$0xff]  ;;  %s3933_s19 = sld [smem:[#allocation47_spill]] (!%p2616_p3) }
 0x188   : > { %1543 = vmatpush.msra.mxu2 %v1517_v16  ;;  %1572 = vmatpush.msra.mxu3 %v1513_v17  ;;  %v1762_v57 = vld [vmem:[%s3618_s7] sm:$0xff]  ;;  %s3929_s7 = sld [smem:[#allocation68_spill]] (!%p2616_p3) }
 0x189   : > { %1585 = vperm.xlu0 %2801, %v1580_v20   ;;  %1711 = vmatpush.msrb.mxu1 %v1688_v32  ;;  %v2805_v20 = vld [vmem:[%s1394_s9] ss:$0 sm:$0xff]  ;;  %s3934_s24 = sld [smem:[#allocation49_spill]] (!%p2616_p3) }
 0x18a   : > { %1771 = vperm.xlu1 %2802, %v1763_v53  }
 0x18b   : > { %1712 = vmatpush.msrb.mxu1 %v1687_v36 }
 0x18c   : > { %s3927_s4 = smov (!%p2616_p3), %s3926_s23 }
 0x18d   : > { %2591 = vmatmul.msk.f32.gmra.mxu0 %vm1448_vm4, %v1447_v14  ;;  %2594 = vmatmul.msk.f32.gmra.mxu1 %vm1448_vm4, %v1483_v15 }
 0x18e   : > { %1713 = vmatpush.msrb.mxu1 %v1686_v39 }
 0x190   : > { %1714 = vmatpush.msrb.mxu1 %v1685_v41 }
 0x191   : > { %1590 = vperm.xlu0 %2801, %v1581_v22  }
 0x192   : > { %1766 = vperm.xlu1 %2802, %v1762_v57  }
 0x195   : > { %2600 = vmatmul.msk.f32.vlgmr.msrb.gmra.mxu0 %vm1603_vm6, %v1600_v21 }
 0x19d   : > { %2601 = vmatmul.msk.f32.gmra.mxu0 %vm1603_vm6, %v1601_v23 }
 0x1fb   : > { %v1586_v29 = vpop.permute.xlu0 %1585 }
 0x1fc   : > { %v1596_v30 = vmul.f32 %v2803_v28, %v1586_v29  ;;  %v1842_v29 = vld [vmem:[%s3594_s10 + $0x18] sm:$0xff]  ;;  %v1772_v41 = vpop.permute.xlu1 %1771 }
 0x1fd   : > { %1858 = vmatpush.msrb.mxu3 %v1842_v29 }
 0x202   : > { %v1476_v24 = vpop.f32.mrf.mxu0  ;;  %v1507_v25 = vpop.f32.mrf.mxu1 }
 0x203   : > { %2595 = vmatmul.msk.f32.vlgmr.msra.gmra.mxu2 %vm1521_vm7, %v1507_v25  ;;  %2597 = vmatmul.msk.f32.vlgmr.msra.gmra.mxu3 %vm1521_vm7, %v1476_v24  ;;  %v1591_v42 = vpop.permute.xlu0 %1590 }
 0x204   : > { %v1597_v46 = vmul.f32 %v2803_v28, %v1591_v42  ;;  %v1767_v57 = vpop.permute.xlu1 %1766 }
 0x20a   : > { %v1479_v26 = vpop.f32.mrf.mxu0  ;;  %v1510_v27 = vpop.f32.mrf.mxu1 }
 0x20b   : > { %2596 = vmatmul.msk.f32.gmra.mxu2 %vm1521_vm7, %v1510_v27  ;;  %2598 = vmatmul.msk.f32.gmra.mxu3 %vm1521_vm7, %v1479_v26 }
 0x212   : > { %v1631_v31 = vpop.f32.mrf.mxu0 }
 0x21a   : > { %v1634_v49 = vpop.f32.mrf.mxu0 }
 0x286   : > { %v1545_v33 = vpop.f32.mrf.mxu2  ;;  %v1574_v34 = vpop.f32.mrf.mxu3 }
 0x287   : > { %v1575_v35 = vadd.f32 %v1574_v34, %v1545_v33 }
 0x289   : > { %v1598_v37 = vadd.f32 %v1596_v30, %v1575_v35  ;;  %v1841_v30 = vld [vmem:[%s3594_s10 + $0x10] sm:$0xff] }
 0x28a   : > { %1859 = vmatpush.msrb.mxu3 %v1841_v30  ;;  %v2807_v30 = vld [vmem:[%s1404_s14] ss:$0 sm:$0xff] }
 0x28b   : > { %v1637_v40 = vadd.f32 %v1631_v31, %v1598_v37  ;;  %v1840_v31 = vld [vmem:[%s3594_s10 + $0x8] sm:$0xff] }
 0x28c   : > { %1860 = vmatpush.msrb.mxu3 %v1840_v31 }
 0x28d   : > { %v1643_v43 = vadd.f32 %v2804_v38, %v1637_v40 }
 0x28e   : > { %v1548_v44 = vpop.f32.mrf.mxu2  ;;  %v1577_v45 = vpop.f32.mrf.mxu3 }
 0x28f   : > { %v2602_v47 = vmul.f32 -1.442695, %v1643_v43  ;;  %v1578_v48 = vadd.f32 %v1577_v45, %v1548_v44 }
 0x291   : > { %2808 = vpow2.f32 %v2602_v47  ;;  %v1599_v50 = vadd.f32 %v1597_v46, %v1578_v48 }
 0x293   : > { %v1638_v51 = vadd.f32 %v1634_v49, %v1599_v50 }
 0x295   : > { %v1644_v52 = vadd.f32 %v2804_v38, %v1638_v51 }
 0x297   : > { %v2809_v54 = vpop.eup %2808  ;;  %v2603_v55 = vmul.f32 -1.442695, %v1644_v52 }
 0x298   : > { %v1651_v56 = vadd.f32 1.0, %v2809_v54 }
 0x299   : > { %2810 = vpow2.f32 %v2603_v55 }
 0x29a   : > { %2812 = vrcp.f32 %v1651_v56  ;;  %v1664_v63 = vand.u32 2147483648, %v1651_v56  ;;  %v1662_v2 = vand.u32 2147483647, %v1651_v56  ;;  %vm1658_vm9 = vweird.f32 %v1651_v56 }
 0x29c   : > { %v1665_v6 = vor.u32 1.1754944e-38, %v1664_v63  ;;  %vm1663_vm11 = vcmp.eq.f32.partialorder %v1662_v2, 8.507059e+37  ;;  %v1836_v63 = vld [vmem:[%s3921_s16 + $0x8] sm:$0xff]  ;;  %v1835_v2 = vld [vmem:[%s3921_s16] sm:$0xff] }
 0x29f   : > { %v2811_v58 = vpop.eup %2810 }
 0x2a0   : > { %v2813_v59 = vpop.eup %2812  ;;  %v1652_v60 = vadd.f32 1.0, %v2811_v58 }
 0x2a1   : > { %v1654_v61 = vmul.f32 %v2813_v59, %v1651_v56  ;;  %vm1659_vm8 = vweird.f32 %v2813_v59 }
 0x2a2   : > { %2814 = vrcp.f32 %v1652_v60  ;;  %vm1660_vm10 = vmor %vm1658_vm9, %vm1659_vm8  ;;  %v1679_v12 = vand.u32 2147483648, %v1652_v60  ;;  %v1677_v14 = vand.u32 2147483647, %v1652_v60  ;;  %vm1673_vm13 = vweird.f32 %v1652_v60 }
 0x2a3   : > { %v1655_v62 = vsub.f32 1.0, %v1654_v61  ;;  %v1838_v61 = vld [vmem:[%s3921_s16 + $0x18] sm:$0xff] }
 0x2a4   : > { %v1680_v16 = vor.u32 1.1754944e-38, %v1679_v12  ;;  %vm1678_vm15 = vcmp.eq.f32.partialorder %v1677_v14, 8.507059e+37  ;;  %v1944_v12 = vld [vmem:[%s3922_s0 + $0x8] sm:$0xff] }
 0x2a5   : > { %v1656_v1 = vmul.f32 %v2813_v59, %v1655_v62  ;;  %v1837_v62 = vld [vmem:[%s3921_s16 + $0x10] sm:$0xff] }
 0x2a7   : > { %v1657_v3 = vadd.f32 %v2813_v59, %v1656_v1  ;;  %v1839_v1 = vld [vmem:[%s3594_s10] sm:$0xff]  ;;  %s3928_s10 = sld [smem:[#allocation43_spill]] (!%p2616_p3) }
 0x2a8   : > { %v2815_v4 = vpop.eup %2814  ;;  %1861 = vmatpush.msrb.mxu3 %v1839_v1 }
 0x2a9   : > { %v1661_v7 = vsel %vm1660_vm10, %v2813_v59, %v1657_v3  ;;  %v1669_v8 = vmul.f32 %v2815_v4, %v1652_v60  ;;  %vm1674_vm12 = vweird.f32 %v2815_v4  ;;  %v1792_v60 = vpop.trf.xlu2  ;;  %vm1808_vm10 = vcmask 97280   ;;  %v1888_v3 = vld [vmem:[%s3646_s3] sm:$0x1f] }
 0x2aa   : > { %v1666_v9 = vsel %vm1663_vm11, %v1665_v6, %v1661_v7  ;;  %vm1675_vm14 = vmor %vm1673_vm13, %vm1674_vm12  ;;  %vm1889_vm11 = vcmask 39936   ;;  %v1946_v7 = vld [vmem:[%s3922_s0 + $0x18] sm:$0xff] }
 0x2ab   : > { %v1683_v10 = vmul.f32 %v1666_v9, %v1643_v43  ;;  %v1670_v11 = vsub.f32 1.0, %v1669_v8  ;;  %1966 = vmatpush.msra.mxu0 %v1946_v7  ;;  %v1945_v9 = vld [vmem:[%s3922_s0 + $0x10] sm:$0xff] }
 0x2ad   : > { %2604 = vmatmul.msk.f32.vlgmr.msrb.gmra.mxu1 %vm1521_vm7, %v1683_v10  ;;  %v1671_v13 = vmul.f32 %v2815_v4, %v1670_v11  ;;  %1967 = vmatpush.msra.mxu0 %v1945_v9  ;;  %v2806_v11 = vld [vmem:[%s1401_s18] ss:$0 sm:$0xff] }
 0x2af   : > { %v1672_v15 = vadd.f32 %v2815_v4, %v1671_v13  ;;  %1968 = vmatpush.msra.mxu0 %v1944_v12 }
 0x2b1   : > { %v1676_v17 = vsel %vm1675_vm14, %v2815_v4, %v1672_v15  ;;  %v1943_v15 = vld [vmem:[%s3922_s0] sm:$0xff] }
 0x2b2   : > { %v1681_v18 = vsel %vm1678_vm15, %v1680_v16, %v1676_v17  ;;  %1969 = vmatpush.msra.mxu0 %v1943_v15 }
 0x2b3   : > { %v1684_v19 = vmul.f32 %v1681_v18, %v1644_v52 }
 0x2b5   : > { %2605 = vmatmul.msk.f32.gmra.mxu1 %vm1521_vm7, %v1684_v19 }
 0x32a   : > { %v1716_v21 = vpop.f32.mrf.mxu1 }
 0x32b   : > { %v1717_v22 = vadd.f32 %v2805_v20, %v1716_v21 }
 0x32d   : > { %v2606_v23 = vmul.f32 -1.442695, %v1717_v22 }
 0x32f   : > { %2816 = vpow2.f32 %v2606_v23 }
 0x332   : > { %v1719_v24 = vpop.f32.mrf.mxu1 }
 0x333   : > { %v1720_v25 = vadd.f32 %v2805_v20, %v1719_v24 }
 0x335   : > { %v2817_v26 = vpop.eup %2816  ;;  %v2607_v27 = vmul.f32 -1.442695, %v1720_v25 }
 0x336   : > { %v1728_v28 = vadd.f32 1.0, %v2817_v26 }
 0x337   : > { %2818 = vpow2.f32 %v2607_v27 }
 0x338   : > { %2820 = vrcp.f32 %v1728_v28  ;;  %v1741_v42 = vand.u32 2147483648, %v1728_v28  ;;  %vm1735_vm1 = vweird.f32 %v1728_v28  ;;  %v1739_v44 = vand.u32 2147483647, %v1728_v28 }
 0x33a   : > { %v1742_v49 = vor.u32 1.1754944e-38, %v1741_v42  ;;  %vm1740_vm6 = vcmp.eq.f32.partialorder %v1739_v44, 8.507059e+37 }
 0x33d   : > { %v2819_v32 = vpop.eup %2818 }
 0x33e   : > { %v2821_v33 = vpop.eup %2820  ;;  %v1729_v34 = vadd.f32 1.0, %v2819_v32 }
 0x33f   : > { %v1731_v35 = vmul.f32 %v2821_v33, %v1728_v28  ;;  %vm1736_vm0 = vweird.f32 %v2821_v33 }
 0x340   : > { %2822 = vrcp.f32 %v1729_v34  ;;  %v1756_v45 = vand.u32 2147483648, %v1729_v34  ;;  %vm1737_vm2 = vmor %vm1735_vm1, %vm1736_vm0  ;;  %v1754_v47 = vand.u32 2147483647, %v1729_v34  ;;  %vm1750_vm5 = vweird.f32 %v1729_v34 }
 0x341   : > { %v1732_v36 = vsub.f32 1.0, %v1731_v35  ;;  %vm1975_vm0 = vcmask 257024  }
 0x342   : > { %v1757_v51 = vor.u32 1.1754944e-38, %v1756_v45  ;;  %vm1755_vm9 = vcmp.eq.f32.partialorder %v1754_v47, 8.507059e+37 }
 0x343   : > { %v1733_v37 = vmul.f32 %v2821_v33, %v1732_v36 }
 0x345   : > { %v1734_v40 = vadd.f32 %v2821_v33, %v1733_v37 }
 0x346   : > { %v2823_v38 = vpop.eup %2822 }
 0x347   : > { %v1746_v39 = vmul.f32 %v2823_v38, %v1729_v34  ;;  %vm1751_vm4 = vweird.f32 %v2823_v38  ;;  %v1738_v48 = vsel %vm1737_vm2, %v2821_v33, %v1734_v40 }
 0x348   : > { %vm1752_vm8 = vmor %vm1750_vm5, %vm1751_vm4  ;;  %v1743_v52 = vsel %vm1740_vm6, %v1742_v49, %v1738_v48 }
 0x349   : > { %v1747_v43 = vsub.f32 1.0, %v1746_v39  ;;  %v1760_v56 = vmul.f32 %v1743_v52, %v1717_v22 }
 0x34b   : > { %v1748_v46 = vmul.f32 %v2823_v38, %v1747_v43  ;;  %v1774_v59 = vmul.f32 %v1767_v57, %v1760_v56 }
 0x34d   : > { %v1749_v50 = vadd.f32 %v2823_v38, %v1748_v46 }
 0x34f   : > { %v1753_v53 = vsel %vm1752_vm8, %v2823_v38, %v1749_v50 }
 0x350   : > { %v1758_v54 = vsel %vm1755_vm9, %v1757_v51, %v1753_v53 }
 0x351   : > { %v1761_v55 = vmul.f32 %v1758_v54, %v1720_v25 }
 0x353   : > { %v1775_v58 = vmul.f32 %v1772_v41, %v1761_v55 }
 0x355   : > { %2608 = vmatpush.msk.msrb.mxu2 %vm1455_vm3, %v1775_v58  ;;  %vm1893_vm3 = vcmask 1044480  }
 0x356   : > { %2612 = vmatpush.msk.msra.mxu3 %vm1893_vm3, %v1888_v3 }
 0x357   : > { %1830 = vmatpush.msrb.mxu2 %v1774_v59 }
 0x358   : > { %2609 = vmatmul.msk.f32.vlgmr.msrb.gmra.mxu2 %vm1808_vm10, %v1792_v60 }
 0x359   : > { %1880 = vmatpush.msra.mxu2 %v1838_v61 }
 0x35b   : > { %1881 = vmatpush.msra.mxu2 %v1837_v62 }
 0x35d   : > { %1882 = vmatpush.msra.mxu2 %v1836_v63 }
 0x35f   : > { %1883 = vmatpush.msra.mxu2 %v1835_v2 }
 0x360   : > { %2611 = vmatmul.msk.f32.vlgmr.msra.gmra.mxu2 %vm1521_vm7, %v3657_v5 }
 0x3db   : > { %v1832_v4 = vpop.f32.mrf.mxu2 }
 0x3dc   : > { %2610 = vmatmul.msk.f32.vlgmr.msrb.gmra.mxu3 %vm1521_vm7, %v1832_v4 }
 0x3e3   : > { %v1885_v8 = vpop.f32.mrf.mxu2 }
 0x3e4   : > { %2613 = vmatmul.msk.f32.vlgmr.msra.gmra.mxu3 %vm1889_vm11, %v3626_v0 }
 0x45f   : > { %v1863_v6 = vpop.f32.mrf.mxu3 }
 0x460   : > { %v1886_v10 = vadd.f32 %v1885_v8, %v1863_v6 }
 0x467   : > { %v1914_v13 = vpop.f32.mrf.mxu3 }
 0x468   : > { %v1917_v14 = vadd.f32 %v1914_v13, %v1886_v10 }
 0x46a   : > { %v1922_v16 = vadd.f32 %v2806_v11, %v1917_v14 }
 0x46c   : > { %v2614_v17 = vmul.f32 -1.442695, %v1922_v16 }
 0x46e   : > { %2824 = vpow2.f32 %v2614_v17 }
 0x474   : > { %v2825_v18 = vpop.eup %2824 }
 0x475   : > { %v1926_v0 = vadd.f32 1.0, %v2825_v18 }
 0x477   : > { %2826 = vrcp.f32 %v1926_v0  ;;  %v1938_v22 = vand.u32 2147483648, %v1926_v0  ;;  %v1936_v24 = vand.u32 2147483647, %v1926_v0  ;;  %vm1932_vm13 = vweird.f32 %v1926_v0 }
 0x479   : > { %v1939_v26 = vor.u32 1.1754944e-38, %v1938_v22  ;;  %vm1937_vm15 = vcmp.eq.f32.partialorder %v1936_v24, 8.507059e+37 }
 0x47d   : > { %v2827_v19 = vpop.eup %2826 }
 0x47e   : > { %v1928_v20 = vmul.f32 %v2827_v19, %v1926_v0  ;;  %vm1933_vm12 = vweird.f32 %v2827_v19 }
 0x47f   : > { %vm1934_vm14 = vmor %vm1932_vm13, %vm1933_vm12 }
 0x480   : > { %v1929_v21 = vsub.f32 1.0, %v1928_v20 }
 0x482   : > { %v1930_v23 = vmul.f32 %v2827_v19, %v1929_v21 }
 0x484   : > { %v1931_v25 = vadd.f32 %v2827_v19, %v1930_v23 }
 0x486   : > { %v1935_v27 = vsel %vm1934_vm14, %v2827_v19, %v1931_v25 }
 0x487   : > { %v1940_v28 = vsel %vm1937_vm15, %v1939_v26, %v1935_v27 }
 0x488   : > { %v1942_v29 = vmul.f32 %v1940_v28, %v1922_v16 }
 0x48a   : > { %2615 = vmatmul.msk.f32.vlgmr.msra.gmra.mxu0 %vm1521_vm7, %v1942_v29 }
 0x507   : > { %v1971_v31 = vpop.f32.mrf.mxu0 }
 0x508   : > { %v1972_v32 = vadd.f32 %v2807_v30, %v1971_v31  ;;  %1980 = sbr.rel (%p2616_p3) target bundleno = 1888 (0x760), region = 172 }
 0x50a   : > { %v1974_v33 = vadd.f32 %v1972_v32, %v3657_v5 }
 0x50c   : > { %1976 = vst.msk [vmem:[#allocation2] sm:$0xf] %vm1975_vm0, %v1974_v33 }
 0x50d   : > { %v1984_v34 = vld [vmem:[%s3925_s11 + $0x18] sm:$0xff]  ;;  %v1983_v35 = vld [vmem:[%s3925_s11 + $0x10] sm:$0xff]  ;;  %v1982_v36 = vld [vmem:[%s3925_s11 + $0x8] sm:$0xff]  ;;  %v3190_v46 = vmov 0  }
 0x50e   : > { %2004 = vmatpush.msra.mxu0 %v1984_v34  ;;  %v1981_v5 = vld [vmem:[%s3925_s11] sm:$0xff]  ;;  %v2035_v37 = vld [vmem:[%s3926_s23 + $0x18] sm:$0xff]  ;;  %v2034_v38 = vld [vmem:[%s3927_s4 + $0x10] sm:$0xff]  ;;  %2828 = vset.pattern.permute.xlu0 %v3190_v46 }
 0x50f   : > { %2055 = vmatpush.msra.mxu1 %v2035_v37  ;;  %v2033_v39 = vld [vmem:[%s3927_s4 + $0x8] sm:$0xff]  ;;  %v2032_v40 = vld [vmem:[%s3927_s4] sm:$0xff]  ;;  %v2073_v45 = vld [vmem:[%s3930_s17 + $0x18] sm:$0xff] }
 0x510   : > { %2005 = vmatpush.msra.mxu0 %v1983_v35  ;;  %v2829_v41 = vld [vmem:[%s3928_s10] ss:$0 sm:$0xff]  ;;  %2093 = vmatpush.msra.mxu2 %v2073_v45  ;;  %v2072_v61 = vld [vmem:[%s3930_s17 + $0x10] sm:$0xff]  ;;  %v2071_v62 = vld [vmem:[%s3930_s17 + $0x8] sm:$0xff] }
 0x511   : > { %2056 = vmatpush.msra.mxu1 %v2034_v38  ;;  %v2063_v44 = vld [vmem:[%s3929_s7] sm:$0xf]  ;;  %v2124_v7 = vld [vmem:[%s3932_s12 + $0x18] sm:$0xff]  ;;  %v2123_v8 = vld [vmem:[%s3932_s12 + $0x10] sm:$0xff] }
 0x512   : > { %2006 = vmatpush.msra.mxu0 %v1982_v36  ;;  %2066 = vperm.xlu0 %2828, %v2063_v44   ;;  %v2070_v63 = vld [vmem:[%s3930_s17] sm:$0xff]  ;;  %v2122_v9 = vld [vmem:[%s3932_s12 + $0x8] sm:$0xff] }
 0x513   : > { %2057 = vmatpush.msra.mxu1 %v2033_v39  ;;  %2094 = vmatpush.msra.mxu2 %v2072_v61  ;;  %v2830_v1 = vld [vmem:[%s3931_s26] ss:$0 sm:$0xff] }
 0x514   : > { %2007 = vmatpush.msra.mxu0 %v1981_v5  ;;  %2144 = vmatpush.msra.mxu3 %v2124_v7  ;;  %v2121_v10 = vld [vmem:[%s3932_s12] sm:$0xff] }
 0x515   : > { %2617 = vmatmul.msk.f32.vlgmr.msra.gmra.mxu0 %vm1521_vm7, %v1974_v33  ;;  %2058 = vmatpush.msra.mxu1 %v2032_v40  ;;  %v2831_v11 = vld [vmem:[%s3933_s19] ss:$0 sm:$0xff] }
 0x516   : > { %2095 = vmatpush.msra.mxu2 %v2071_v62  ;;  %2145 = vmatpush.msra.mxu3 %v2123_v8  ;;  %v2832_v27 = vld [vmem:[%s3934_s24] ss:$0 sm:$0xff] }
 0x518   : > { %2096 = vmatpush.msra.mxu2 %v2070_v63  ;;  %2146 = vmatpush.msra.mxu3 %v2122_v9 }
 0x51a   : > { %2147 = vmatpush.msra.mxu3 %v2121_v10 }
 0x584   : > { %v2067_v3 = vpop.permute.xlu0 %2066 }
 0x592   : > { %v2009_v42 = vpop.f32.mrf.mxu0 }
 0x593   : > { %v2010_v43 = vadd.f32 %v2829_v41, %v2009_v42 }
 0x595   : > { %v2618_v47 = vmul.f32 -1.442695, %v2010_v43 }
 0x597   : > { %2833 = vpow2.f32 %v2618_v47 }
 0x59d   : > { %v2834_v48 = vpop.eup %2833 }
 0x59e   : > { %v2015_v49 = vadd.f32 1.0, %v2834_v48 }
 0x5a0   : > { %2835 = vrcp.f32 %v2015_v49  ;;  %v2027_v53 = vand.u32 2147483648, %v2015_v49  ;;  %v2025_v55 = vand.u32 2147483647, %v2015_v49  ;;  %vm2021_vm2 = vweird.f32 %v2015_v49 }
 0x5a2   : > { %v2028_v57 = vor.u32 1.1754944e-38, %v2027_v53  ;;  %vm2026_vm5 = vcmp.eq.f32.partialorder %v2025_v55, 8.507059e+37 }
 0x5a6   : > { %v2836_v50 = vpop.eup %2835 }
 0x5a7   : > { %v2017_v51 = vmul.f32 %v2836_v50, %v2015_v49  ;;  %vm2022_vm1 = vweird.f32 %v2836_v50 }
 0x5a8   : > { %vm2023_vm4 = vmor %vm2021_vm2, %vm2022_vm1 }
 0x5a9   : > { %v2018_v52 = vsub.f32 1.0, %v2017_v51 }
 0x5ab   : > { %v2019_v54 = vmul.f32 %v2836_v50, %v2018_v52 }
 0x5ad   : > { %v2020_v56 = vadd.f32 %v2836_v50, %v2019_v54 }
 0x5af   : > { %v2024_v58 = vsel %vm2023_vm4, %v2836_v50, %v2020_v56 }
 0x5b0   : > { %v2029_v59 = vsel %vm2026_vm5, %v2028_v57, %v2024_v58 }
 0x5b1   : > { %v2031_v60 = vmul.f32 %v2029_v59, %v2010_v43 }
 0x5b3   : > { %2619 = vmatmul.msk.f32.vlgmr.msra.gmra.mxu1 %vm1521_vm7, %v2031_v60 }
 0x630   : > { %v2060_v2 = vpop.f32.mrf.mxu1 }
 0x631   : > { %v2061_v4 = vadd.f32 %v2830_v1, %v2060_v2 }
 0x633   : > { %v2069_v6 = vmul.f32 %v2067_v3, %v2061_v4 }
 0x635   : > { %2620 = vmatmul.msk.f32.vlgmr.msra.gmra.mxu2 %vm1521_vm7, %v2069_v6 }
 0x6b8   : > { %v2098_v12 = vpop.f32.mrf.mxu2 }
 0x6b9   : > { %v2099_v13 = vadd.f32 %v2831_v11, %v2098_v12 }
 0x6bb   : > { %v2621_v14 = vmul.f32 -1.442695, %v2099_v13 }
 0x6bd   : > { %2837 = vpow2.f32 %v2621_v14 }
 0x6c3   : > { %v2838_v15 = vpop.eup %2837 }
 0x6c4   : > { %v2104_v16 = vadd.f32 1.0, %v2838_v15 }
 0x6c6   : > { %2839 = vrcp.f32 %v2104_v16  ;;  %v2116_v19 = vand.u32 2147483648, %v2104_v16  ;;  %v2114_v21 = vand.u32 2147483647, %v2104_v16  ;;  %vm2110_vm8 = vweird.f32 %v2104_v16 }
 0x6c8   : > { %v2117_v23 = vor.u32 1.1754944e-38, %v2116_v19  ;;  %vm2115_vm10 = vcmp.eq.f32.partialorder %v2114_v21, 8.507059e+37 }
 0x6cc   : > { %v2840_v17 = vpop.eup %2839 }
 0x6cd   : > { %v2106_v18 = vmul.f32 %v2840_v17, %v2104_v16  ;;  %vm2111_vm6 = vweird.f32 %v2840_v17 }
 0x6ce   : > { %vm2112_vm9 = vmor %vm2110_vm8, %vm2111_vm6 }
 0x6cf   : > { %v2107_v0 = vsub.f32 1.0, %v2106_v18 }
 0x6d1   : > { %v2108_v20 = vmul.f32 %v2840_v17, %v2107_v0 }
 0x6d3   : > { %v2109_v22 = vadd.f32 %v2840_v17, %v2108_v20 }
 0x6d5   : > { %v2113_v24 = vsel %vm2112_vm9, %v2840_v17, %v2109_v22 }
 0x6d6   : > { %v2118_v25 = vsel %vm2115_vm10, %v2117_v23, %v2113_v24 }
 0x6d7   : > { %v2120_v26 = vmul.f32 %v2118_v25, %v2099_v13 }
 0x6d9   : > { %2622 = vmatmul.msk.f32.vlgmr.msra.gmra.mxu3 %vm1521_vm7, %v2120_v26 }
 0x75c   : > { %v2149_v28 = vpop.f32.mrf.mxu3 }
 0x75d   : > { %v2150_v29 = vadd.f32 %v2832_v27, %v2149_v28 }
 0x75f   : > { %2152 = vst [vmem:[%s1348_s5] sm:$0xf] %v2150_v29 }
 0x760 PF: > { %s3935_s2 = sld [smem:[#allocation56_spill]]  ;;  %s2166_s9 = sshll.u32 %s1348_s5, 4  ;;  %s2167_s9 = int_to_ptr.vmem [resolvable:$true] %s2166_s9 }
 0x761   : > { %s3936_s22 = sld [smem:[#allocation50_spill]] }
 0x762   : > { %s3938_s15 = sld [smem:[#allocation52_spill]] }
 0x766   : > { %s2624_s8 = sshll.u32 %s3935_s2, 2 }
 0x767   : > { %s3937_s29 = smov %s3936_s22  ;;  %s2164_s27 = scalar_lea.hbm %s3936_s22, %s2624_s8 }
 0x768   : > { %s2168_s21 = sshll.u32 %s2164_s27, 4  ;;  %s3940_s3 = sand.u32 1, %s3938_s15   ;;  %s2169_s21 = int_to_ptr.hbm [resolvable:$true] %s2168_s21 }
 0x769   : > { %s2154_s18 = scalar_lea.sflag [#allocation5], %s3940_s3  ;;  %s3035_s14 = sshra.s32 %s2169_s21, 4  ;;  %s3036_s14 = int_to_ptr.hbm [resolvable:$true] %s3035_s14 }
 0x76a   : > { %s3037_s30 = scalar_lea.hbm %s3036_s14, 4  ;;  %s3041_s6 = scalar_lea.hbm %s3937_s29, 8 }
 0x76b   : > { %p3038_p5 = scmp.ne.s32.totalorder %s3036_s14, %s3037_s30  ;;  %p3042_p0 = scmp.lt.s32.totalorder %s3036_s14, %s3937_s29 }
 0x76c   : > { %p3043_p1 = scmp.lt.s32.totalorder %s3041_s6, %s3037_s30 }
 0x76d   : > { %p3039_p11 = pnand %p3038_p5, %p3443_p12 }
 0x76e   : > { %p3044_p7 = por %p3043_p1, %p3042_p0 }
 0x76f   : > { %p3040_p13 = pneg %p3039_p11 }
 0x771   : > { %p3045_p9 = pnand %p3044_p7, %p3040_p13 }
 0x773   : > { %3048 = shalt.err (!%p3045_p9)
}
 0x774   : > { %2650 = dma.vmem_to_hbm [thread:$0]  (%p3443_p12), %s2167_s9, 64, %s2169_s21, %s2154_s18  }
 0x775 PF: > { %s3941_s5 = sld [smem:[#allocation59_spill]] }
 0x776   : > { %s3942_s13 = sld [smem:[#allocation51_spill]] }
 0x77b   : > { %p2676_p10 = scmp.ge.s32.totalorder %s3941_s5, 2 }
 0x77c   : > { %s2180_s16 = sand.u32 1, %s3942_s13  }
 0x77d   : > { %p2672_p4 = pnand %p2676_p10, %p3453_p2  ;;  %s2181_s0 = scalar_lea.sflag [#allocation5], %s2180_s16 }
 0x77f   : > { %p2673_p8 = pneg %p2672_p4 }
 0x781   : > { %3110 = dma.done.wait (%p2673_p8), %s2181_s0, 64  }
 0x782   : > { %3112 = vsyncadd (%p2673_p8), %s2181_s0, 4294967232  ;;  %s86_s7 = sadd.s32 1, %s3941_s5   ;;  %s3944_s15 = sld [smem:[#allocation52_spill]] }
 0x783   : > { %p83_p6 = scmp.ge.s32.totalorder %s86_s7, 10   ;;  %s3945_s16 = sld [smem:[#allocation53_spill]] }
 0x784   : > { %s3946_s18 = sld [smem:[#allocation63_spill]] }
 0x785   : > { %s3947_s22 = sld [smem:[#allocation54_spill]] }
 0x786   : > { %s3948_s0 = sld [smem:[#allocation55_spill]] }
 0x787   : > { %s3949_s23 = sld [smem:[#allocation62_spill]]  ;;  %85 = sbr.rel (!%p83_p6) target bundleno = 83 (0x53), region = 326 }
 0x788   : > { %s3950_s26 = sld [smem:[#allocation57_spill]] }
 0x789   : > { %s3951_s28 = sld [smem:[#allocation58_spill]] }
 0x78a   : > { %s3952_s1 = sld [smem:[#allocation60_spill]] }
 0x78b   : > { %s3953_s2 = sld [smem:[#allocation61_spill]] }
 0x78c   :  { %2187 = vsyncpa [#allocation4], 1 }
 0x78d   :  { %2189 = vsyncpa [#allocation4 + $0x1], 1 }
 0x78e   :  { %2190 = vsyncpa [#allocation7], 1 }
 0x78f   :  { %2192 = vsyncpa [#allocation7 + $0x1], 1 }
 0x790   :  { %2193 = vsyncpa [#allocation10], 1 }
 0x791   :  { %2195 = vsyncpa [#allocation10 + $0x1], 1 }
 0x792   :  { %2196 = vsyncpa [#allocation13], 1 }
 0x793   :  { %2198 = vsyncpa [#allocation13 + $0x1], 1 }
 0x794   :  { %2199 = vsyncpa [#allocation5], 1 }
 0x795   :  { %2201 = vsyncpa [#allocation5 + $0x1], 1 }

</bundles_post_ra>
